<compile_context>
chip_gen: v5e
topology: v5e:2x2
jax: 0.10.0
libtpu: 0.0.40
codegen_flags: <defaults>
</compile_context>

<pallas_src>
import numpy as np

import jax
import jax.numpy as jnp
from jax.experimental import pallas as pl
from jax.experimental.pallas import tpu as pltpu

SELU_ALPHA = 1.6732632423543772
SELU_SCALE = 1.0507009873554805


def _selu(x):
    return SELU_SCALE * jnp.where(x > 0, x, SELU_ALPHA * (jnp.exp(x) - 1.0))


def _round_up(x, m):
    return ((x + m - 1) // m) * m


# ----------------------------------------------------------------------------
# Fused decoder kernel.
#
# In-kernel layout: activations are 2-D (rows, lanes) with
#   rows  = block_row * bt + batch      (block_row = input_y // 4)
#   lanes = everything else (x position, channel, y-parity) flattened.
# Each stride-2 conv is   sum_{dy in {-1,0}}  slab(dy) @ W_dense(dy)
# where slab(dy) is a contiguous row slice of the top-padded activation.
# ----------------------------------------------------------------------------
def _decoder_kernel(xt_ref, w1d_ref, b1d_ref, w2d_ref, b2d_ref,
                    wf1_ref, bf1_ref, wf2_ref, bf2_ref,
                    o_ref, x1p_ref, x2p_ref):
    bt = o_ref.shape[0]
    f32 = jnp.float32

    # Stage the space-to-depth input into a top-padded scratch:
    #   rows [0, bt)               -> zero pad (block-row -1)
    #   rows [(i+1)*bt, (i+2)*bt)  -> input block-row i
    x1p_ref[pl.ds(0, bt), :] = jnp.zeros((bt, 384), f32)
    for i in range(8):
        x1p_ref[pl.ds((i + 1) * bt, bt), :] = xt_ref[i, :, :]

    # DownBlock1SS #1: Conv2d(3->8, 3x3, stride 2, pad 1) + SELU
    pre1 = jnp.zeros((8 * bt, 256), f32)
    for s in range(2):                                   # block-row shift dy = s - 1
        slab = x1p_ref[pl.ds(s * bt, 8 * bt), :]         # (8*bt, 384)
        pre1 = pre1 + jnp.dot(slab, w1d_ref[s, :, :],
                              preferred_element_type=f32)
    h1 = _selu(pre1 + b1d_ref[...])                      # (8*bt, 256)

    # DownBlock1SS #2: Conv2d(8->4, 3x3, stride 2, pad 1) + SELU
    x2p_ref[pl.ds(0, bt), :] = jnp.zeros((bt, 256), f32)
    x2p_ref[pl.ds(bt, 8 * bt), :] = h1
    pre2 = jnp.zeros((8 * bt, 32), f32)
    for s in range(2):
        slab = x2p_ref[pl.ds(s * bt, 8 * bt), :]         # (8*bt, 256)
        pre2 = pre2 + jnp.dot(slab, w2d_ref[s, :, :],
                              preferred_element_type=f32)
    h2 = _selu(pre2 + b2d_ref[...])                      # (8*bt, 32)

    # FullyConnectedLayerSS(256, 8): NCHW flatten permutation is folded into
    # wf1; one (bt,32)@(32,8) matmul per block-row.
    pre3 = jnp.zeros((bt, 8), f32)
    for h in range(8):
        pre3 = pre3 + jnp.dot(h2[h * bt:(h + 1) * bt, :], wf1_ref[h, :, :],
                              preferred_element_type=f32)
    o1 = _selu(pre3 + bf1_ref[...])                      # (bt, 8)

    # FullyConnectedLayerSS(8, 2)
    o2 = _selu(jnp.dot(o1, wf2_ref[...], preferred_element_type=f32)
               + bf2_ref[...])
    o_ref[...] = o2


# ----------------------------------------------------------------------------
# Host-side (one-time) weight packing: scatter the 3x3 stride-2 conv weights
# into dense per-shift column matrices and fold the flatten permutation into
# the FC1 weight.
# ----------------------------------------------------------------------------
def prepare_params(params):
    w1 = np.asarray(params["w_d1"], np.float32)    # (8, 3, 3, 3)
    b1 = np.asarray(params["b_d1"], np.float32)    # (8,)
    w2 = np.asarray(params["w_d2"], np.float32)    # (4, 8, 3, 3)
    b2 = np.asarray(params["b_d2"], np.float32)    # (4,)
    wf1 = np.asarray(params["w_fc1"], np.float32)  # (8, 256)
    bf1 = np.asarray(params["b_fc1"], np.float32)  # (8,)
    wf2 = np.asarray(params["w_fc2"], np.float32)  # (2, 8)
    bf2 = np.asarray(params["b_fc2"], np.float32)  # (2,)

    # conv1: lanes-in  l1 = ry*96 + w*3 + c   (input y = 4*block_row + ry)
    #        lanes-out l2 = qy*128 + ox*8 + d (output y = 2*block_row + qy)
    w1d = np.zeros((2, 384, 256), np.float32)
    for s in range(2):                 # block-row shift dy = s - 1
        dy = s - 1
        for qy in range(2):
            for ky in range(3):
                ry = ky + 2 * qy - 1 - 4 * dy
                if not 0 <= ry <= 3:
                    continue
                for kx in range(3):
                    for ox in range(16):
                        wi = 2 * ox + kx - 1
                        if not 0 <= wi <= 31:
                            continue
                        l1 = ry * 96 + wi * 3
                        l2 = qy * 128 + ox * 8
                        w1d[s, l1:l1 + 3, l2:l2 + 8] = w1[:, :, ky, kx].T
    b1d = np.tile(b1, 32).reshape(1, 256)

    # conv2: lanes-in  l2 = qy*128 + ox*8 + d
    #        lanes-out l3 = ox2*4 + e
    w2d = np.zeros((2, 256, 32), np.float32)
    for s in range(2):
        dy = s - 1
        for qy in range(2):
            ky = 2 * dy + qy + 1
            if not 0 <= ky <= 2:
                continue
            for kx in range(3):
                for ox2 in range(8):
                    ox = 2 * ox2 + kx - 1
                    if not 0 <= ox <= 15:
                        continue
                    l2 = qy * 128 + ox * 8
                    l3 = ox2 * 4
                    w2d[s, l2:l2 + 8, l3:l3 + 4] = w2[:, :, ky, kx].T
    b2d = np.tile(b2, 8).reshape(1, 32)

    # FC1: torch flattens NCHW as idx = e*64 + h*8 + ox2; fold that permutation.
    wfc1h = np.zeros((8, 32, 8), np.float32)
    for h in range(8):
        for ox2 in range(8):
            for e in range(4):
                wfc1h[h, ox2 * 4 + e, :] = wf1[:, e * 64 + h * 8 + ox2]
    bfc1 = bf1.reshape(1, 8)

    wfc2m = np.ascontiguousarray(wf2.T)            # (8, 2)
    bfc2 = bf2.reshape(1, 2)

    return tuple(jnp.asarray(a) for a in
                 (w1d, b1d, w2d, b2d, wfc1h, bfc1, wfc2m, bfc2))


# ----------------------------------------------------------------------------
# Wrapper: batch padding/tiling + space-to-depth along H only (cheap, 1x size).
# ----------------------------------------------------------------------------
def _batch_tile(n):
    return min(64, _round_up(n, 8))


@jax.jit
def generate_decoder_forward(x, prep):
    n = x.shape[0]
    bt = _batch_tile(n)
    npad = _round_up(n, bt)
    if npad != n:
        x = jnp.pad(x, ((0, npad - n), (0, 0), (0, 0), (0, 0)))

    # (N,3,32,32) -> (block_row=8, N, 384) with lane l1 = ry*96 + w*3 + c.
    xt = (x.reshape(npad, 3, 8, 4, 32)
           .transpose(2, 0, 3, 4, 1)
           .reshape(8, npad, 384))

    grid = (npad // bt,)
    out = pl.pallas_call(
        _decoder_kernel,
        out_shape=jax.ShapeDtypeStruct((npad, 2), jnp.float32),
        grid_spec=pltpu.PrefetchScalarGridSpec(
            num_scalar_prefetch=0,
            grid=grid,
            in_specs=[
                pl.BlockSpec((8, bt, 384), lambda i: (0, i, 0)),   # xt
                pl.BlockSpec((2, 384, 256), lambda i: (0, 0, 0)),  # conv1 W
                pl.BlockSpec((1, 256), lambda i: (0, 0)),          # conv1 b
                pl.BlockSpec((2, 256, 32), lambda i: (0, 0, 0)),   # conv2 W
                pl.BlockSpec((1, 32), lambda i: (0, 0)),           # conv2 b
                pl.BlockSpec((8, 32, 8), lambda i: (0, 0, 0)),     # fc1 W
                pl.BlockSpec((1, 8), lambda i: (0, 0)),            # fc1 b
                pl.BlockSpec((8, 2), lambda i: (0, 0)),            # fc2 W
                pl.BlockSpec((1, 2), lambda i: (0, 0)),            # fc2 b
            ],
            out_specs=pl.BlockSpec((bt, 2), lambda i: (i, 0)),
            scratch_shapes=[
                pltpu.VMEM((9 * bt, 384), jnp.float32),
                pltpu.VMEM((9 * bt, 256), jnp.float32),
            ],
        ),
        compiler_params=pltpu.CompilerParams(
            dimension_semantics=("parallel",),
            vmem_limit_bytes=32 * 1024 * 1024,
        ),
    )(xt, *prep)
    return out[:n]


# ----------------------------------------------------------------------------
# Pure-JAX reference (same assumed submodule semantics) for a numeric check.
# ----------------------------------------------------------------------------
@jax.jit
def reference_forward(x, params):
    hp = jax.lax.Precision.HIGHEST

    def down(h, w, b):
        y = jax.lax.conv_general_dilated(
            h, w, window_strides=(2, 2), padding=((1, 1), (1, 1)),
            dimension_numbers=("NCHW", "OIHW", "NCHW"), precision=hp)
        return _selu(y + b.reshape(1, -1, 1, 1))

    h = down(x, params["w_d1"], params["b_d1"])            # (N, 8, 16, 16)
    h = down(h, params["w_d2"], params["b_d2"])            # (N, 4, 8, 8)
    f = h.reshape(h.shape[0], 256)                         # NCHW .view(-1, 256)
    f = _selu(jnp.dot(f, params["w_fc1"].T, precision=hp) + params["b_fc1"])
    f = _selu(jnp.dot(f, params["w_fc2"].T, precision=hp) + params["b_fc2"])
    return f


def init_params(key):
    ks = jax.random.split(key, 8)
    s = 0.2
    return {
        # conv weights in PyTorch layout (Cout, Cin, KH, KW)
        "w_d1": s * jax.random.normal(ks[0], (8, 3, 3, 3), jnp.float32),
        "b_d1": s * jax.random.normal(ks[1], (8,), jnp.float32),
        "w_d2": s * jax.random.normal(ks[2], (4, 8, 3, 3), jnp.float32),
        "b_d2": s * jax.random.normal(ks[3], (4,), jnp.float32),
        # linear weights in PyTorch layout (out, in)
        "w_fc1": s * jax.random.normal(ks[4], (8, 256), jnp.float32),
        "b_fc1": s * jax.random.normal(ks[5], (8,), jnp.float32),
        "w_fc2": s * jax.random.normal(ks[6], (2, 8), jnp.float32),
        "b_fc2": s * jax.random.normal(ks[7], (2,), jnp.float32),
    }


if __name__ == "__main__":
    key = jax.random.PRNGKey(0)
    pkey, xkey = jax.random.split(key)
    params = init_params(pkey)
    prep = prepare_params(params)

    batch = 2
    x = jax.random.normal(xkey, (batch, 3, 32, 32), jnp.float32)

    out = generate_decoder_forward(x, prep)
    out = jax.block_until_ready(out)

    assert out.shape == (batch, 2), out.shape
    assert bool(jnp.all(jnp.isfinite(out)))

    ref = jax.block_until_ready(reference_forward(x, params))
    np.testing.assert_allclose(np.asarray(out), np.asarray(ref),
                               rtol=5e-2, atol=5e-2)
    print("KERNEL_OK")
</pallas_src>

<mosaic_0001>
module attributes {stable_mosaic.version = 11 : i64} {
  func.func @_decoder_kernel(%arg0: i32, %arg1: memref<8x8x384xf32, #tpu.memory_space<vmem>>, %arg2: memref<2x384x256xf32, #tpu.memory_space<vmem>>, %arg3: memref<1x256xf32, #tpu.memory_space<vmem>>, %arg4: memref<2x256x32xf32, #tpu.memory_space<vmem>>, %arg5: memref<1x32xf32, #tpu.memory_space<vmem>>, %arg6: memref<8x32x8xf32, #tpu.memory_space<vmem>>, %arg7: memref<1x8xf32, #tpu.memory_space<vmem>>, %arg8: memref<8x2xf32, #tpu.memory_space<vmem>>, %arg9: memref<1x2xf32, #tpu.memory_space<vmem>>, %arg10: memref<8x2xf32, #tpu.memory_space<vmem>>, %arg11: memref<72x384xf32, #tpu.memory_space<vmem>>, %arg12: memref<72x256xf32, #tpu.memory_space<vmem>>) attributes {dimension_semantics = [#tpu.dimension_semantics<parallel>], iteration_bounds = array<i64: 1>, scalar_prefetch = 0 : i64, scratch_operands = 2 : i64, tpu.core_type = #tpu.core_type<tc>, window_params = [{transform_indices = @transform_0, window_bounds = array<i64: 8, 8, 384>}, {pipeline_mode = #tpu.pipeline_mode<synchronous>, transform_indices = @transform_1, window_bounds = array<i64: 2, 384, 256>}, {pipeline_mode = #tpu.pipeline_mode<synchronous>, transform_indices = @transform_2, window_bounds = array<i64: 1, 256>}, {pipeline_mode = #tpu.pipeline_mode<synchronous>, transform_indices = @transform_3, window_bounds = array<i64: 2, 256, 32>}, {pipeline_mode = #tpu.pipeline_mode<synchronous>, transform_indices = @transform_4, window_bounds = array<i64: 1, 32>}, {pipeline_mode = #tpu.pipeline_mode<synchronous>, transform_indices = @transform_5, window_bounds = array<i64: 8, 32, 8>}, {pipeline_mode = #tpu.pipeline_mode<synchronous>, transform_indices = @transform_6, window_bounds = array<i64: 1, 8>}, {pipeline_mode = #tpu.pipeline_mode<synchronous>, transform_indices = @transform_7, window_bounds = array<i64: 8, 2>}, {pipeline_mode = #tpu.pipeline_mode<synchronous>, transform_indices = @transform_8, window_bounds = array<i64: 1, 2>}, {transform_indices = @transform_9, window_bounds = array<i64: 8, 2>}]} {
    %cst = arith.constant 0.000000e+00 : f32
    %0 = vector.broadcast %cst : f32 to vector<8x384xf32>
    %c0 = arith.constant 0 : index
    %c0_0 = arith.constant 0 : index
    %1 = vector.load %arg11[%c0, %c0_0] : memref<72x384xf32, #tpu.memory_space<vmem>>, vector<8x384xf32>
    tpu.vector_store %arg11[%c0, %c0_0], %0 {strides = array<i32>} : memref<72x384xf32, #tpu.memory_space<vmem>>, vector<8x384xf32>,
    %c0_1 = arith.constant 0 : index
    %c0_2 = arith.constant 0 : index
    %c0_3 = arith.constant 0 : index
    %2 = vector.load %arg1[%c0_1, %c0_2, %c0_3] : memref<8x8x384xf32, #tpu.memory_space<vmem>>, vector<1x8x384xf32>
    %3 = vector.shape_cast %2 : vector<1x8x384xf32> to vector<8x384xf32>
    %c8 = arith.constant 8 : index
    %c0_4 = arith.constant 0 : index
    %4 = vector.load %arg11[%c8, %c0_4] : memref<72x384xf32, #tpu.memory_space<vmem>>, vector<8x384xf32>
    tpu.vector_store %arg11[%c8, %c0_4], %3 {strides = array<i32>} : memref<72x384xf32, #tpu.memory_space<vmem>>, vector<8x384xf32>,
    %c1 = arith.constant 1 : index
    %c0_5 = arith.constant 0 : index
    %c0_6 = arith.constant 0 : index
    %5 = vector.load %arg1[%c1, %c0_5, %c0_6] : memref<8x8x384xf32, #tpu.memory_space<vmem>>, vector<1x8x384xf32>
    %6 = vector.shape_cast %5 : vector<1x8x384xf32> to vector<8x384xf32>
    %c16 = arith.constant 16 : index
    %c0_7 = arith.constant 0 : index
    %7 = vector.load %arg11[%c16, %c0_7] : memref<72x384xf32, #tpu.memory_space<vmem>>, vector<8x384xf32>
    tpu.vector_store %arg11[%c16, %c0_7], %6 {strides = array<i32>} : memref<72x384xf32, #tpu.memory_space<vmem>>, vector<8x384xf32>,
    %c2 = arith.constant 2 : index
    %c0_8 = arith.constant 0 : index
    %c0_9 = arith.constant 0 : index
    %8 = vector.load %arg1[%c2, %c0_8, %c0_9] : memref<8x8x384xf32, #tpu.memory_space<vmem>>, vector<1x8x384xf32>
    %9 = vector.shape_cast %8 : vector<1x8x384xf32> to vector<8x384xf32>
    %c24 = arith.constant 24 : index
    %c0_10 = arith.constant 0 : index
    %10 = vector.load %arg11[%c24, %c0_10] : memref<72x384xf32, #tpu.memory_space<vmem>>, vector<8x384xf32>
    tpu.vector_store %arg11[%c24, %c0_10], %9 {strides = array<i32>} : memref<72x384xf32, #tpu.memory_space<vmem>>, vector<8x384xf32>,
    %c3 = arith.constant 3 : index
    %c0_11 = arith.constant 0 : index
    %c0_12 = arith.constant 0 : index
    %11 = vector.load %arg1[%c3, %c0_11, %c0_12] : memref<8x8x384xf32, #tpu.memory_space<vmem>>, vector<1x8x384xf32>
    %12 = vector.shape_cast %11 : vector<1x8x384xf32> to vector<8x384xf32>
    %c32 = arith.constant 32 : index
    %c0_13 = arith.constant 0 : index
    %13 = vector.load %arg11[%c32, %c0_13] : memref<72x384xf32, #tpu.memory_space<vmem>>, vector<8x384xf32>
    tpu.vector_store %arg11[%c32, %c0_13], %12 {strides = array<i32>} : memref<72x384xf32, #tpu.memory_space<vmem>>, vector<8x384xf32>,
    %c4 = arith.constant 4 : index
    %c0_14 = arith.constant 0 : index
    %c0_15 = arith.constant 0 : index
    %14 = vector.load %arg1[%c4, %c0_14, %c0_15] : memref<8x8x384xf32, #tpu.memory_space<vmem>>, vector<1x8x384xf32>
    %15 = vector.shape_cast %14 : vector<1x8x384xf32> to vector<8x384xf32>
    %c40 = arith.constant 40 : index
    %c0_16 = arith.constant 0 : index
    %16 = vector.load %arg11[%c40, %c0_16] : memref<72x384xf32, #tpu.memory_space<vmem>>, vector<8x384xf32>
    tpu.vector_store %arg11[%c40, %c0_16], %15 {strides = array<i32>} : memref<72x384xf32, #tpu.memory_space<vmem>>, vector<8x384xf32>,
    %c5 = arith.constant 5 : index
    %c0_17 = arith.constant 0 : index
    %c0_18 = arith.constant 0 : index
    %17 = vector.load %arg1[%c5, %c0_17, %c0_18] : memref<8x8x384xf32, #tpu.memory_space<vmem>>, vector<1x8x384xf32>
    %18 = vector.shape_cast %17 : vector<1x8x384xf32> to vector<8x384xf32>
    %c48 = arith.constant 48 : index
    %c0_19 = arith.constant 0 : index
    %19 = vector.load %arg11[%c48, %c0_19] : memref<72x384xf32, #tpu.memory_space<vmem>>, vector<8x384xf32>
    tpu.vector_store %arg11[%c48, %c0_19], %18 {strides = array<i32>} : memref<72x384xf32, #tpu.memory_space<vmem>>, vector<8x384xf32>,
    %c6 = arith.constant 6 : index
    %c0_20 = arith.constant 0 : index
    %c0_21 = arith.constant 0 : index
    %20 = vector.load %arg1[%c6, %c0_20, %c0_21] : memref<8x8x384xf32, #tpu.memory_space<vmem>>, vector<1x8x384xf32>
    %21 = vector.shape_cast %20 : vector<1x8x384xf32> to vector<8x384xf32>
    %c56 = arith.constant 56 : index
    %c0_22 = arith.constant 0 : index
    %22 = vector.load %arg11[%c56, %c0_22] : memref<72x384xf32, #tpu.memory_space<vmem>>, vector<8x384xf32>
    tpu.vector_store %arg11[%c56, %c0_22], %21 {strides = array<i32>} : memref<72x384xf32, #tpu.memory_space<vmem>>, vector<8x384xf32>,
    %c7 = arith.constant 7 : index
    %c0_23 = arith.constant 0 : index
    %c0_24 = arith.constant 0 : index
    %23 = vector.load %arg1[%c7, %c0_23, %c0_24] : memref<8x8x384xf32, #tpu.memory_space<vmem>>, vector<1x8x384xf32>
    %24 = vector.shape_cast %23 : vector<1x8x384xf32> to vector<8x384xf32>
    %c64 = arith.constant 64 : index
    %c0_25 = arith.constant 0 : index
    %25 = vector.load %arg11[%c64, %c0_25] : memref<72x384xf32, #tpu.memory_space<vmem>>, vector<8x384xf32>
    tpu.vector_store %arg11[%c64, %c0_25], %24 {strides = array<i32>} : memref<72x384xf32, #tpu.memory_space<vmem>>, vector<8x384xf32>,
    %cst_26 = arith.constant 0.000000e+00 : f32
    %26 = vector.broadcast %cst_26 : f32 to vector<64x256xf32>
    %c0_27 = arith.constant 0 : index
    %c0_28 = arith.constant 0 : index
    %27 = vector.load %arg11[%c0_27, %c0_28] : memref<72x384xf32, #tpu.memory_space<vmem>>, vector<64x384xf32>
    %c0_29 = arith.constant 0 : index
    %c0_30 = arith.constant 0 : index
    %c0_31 = arith.constant 0 : index
    %28 = vector.load %arg2[%c0_29, %c0_30, %c0_31] : memref<2x384x256xf32, #tpu.memory_space<vmem>>, vector<1x384x256xf32>
    %29 = vector.shape_cast %28 : vector<1x384x256xf32> to vector<384x256xf32>
    %cst_32 = arith.constant dense<0.000000e+00> : vector<64x256xf32>
    %30 = tpu.matmul %27, %29, %cst_32 {dimension_numbers = #tpu.dot_dimension_numbers<[1], [0], [0], [1], [0, 0, 1, 1], [], []>} : vector<64x384xf32>, vector<384x256xf32>, vector<64x256xf32> -> vector<64x256xf32>
    %31 = arith.addf %26, %30 : vector<64x256xf32>
    %c8_33 = arith.constant 8 : index
    %c0_34 = arith.constant 0 : index
    %32 = vector.load %arg11[%c8_33, %c0_34] : memref<72x384xf32, #tpu.memory_space<vmem>>, vector<64x384xf32>
    %c1_35 = arith.constant 1 : index
    %c0_36 = arith.constant 0 : index
    %c0_37 = arith.constant 0 : index
    %33 = vector.load %arg2[%c1_35, %c0_36, %c0_37] : memref<2x384x256xf32, #tpu.memory_space<vmem>>, vector<1x384x256xf32>
    %34 = vector.shape_cast %33 : vector<1x384x256xf32> to vector<384x256xf32>
    %cst_38 = arith.constant dense<0.000000e+00> : vector<64x256xf32>
    %35 = tpu.matmul %32, %34, %cst_38 {dimension_numbers = #tpu.dot_dimension_numbers<[1], [0], [0], [1], [0, 0, 1, 1], [], []>} : vector<64x384xf32>, vector<384x256xf32>, vector<64x256xf32> -> vector<64x256xf32>
    %36 = arith.addf %31, %35 : vector<64x256xf32>
    %c0_39 = arith.constant 0 : index
    %c0_40 = arith.constant 0 : index
    %37 = vector.load %arg3[%c0_39, %c0_40] : memref<1x256xf32, #tpu.memory_space<vmem>>, vector<1x256xf32>
    %38 = vector.broadcast %37 : vector<1x256xf32> to vector<64x256xf32>
    %39 = arith.addf %36, %38 : vector<64x256xf32>
    %cst_41 = arith.constant 0.000000e+00 : f32
    %40 = vector.broadcast %cst_41 : f32 to vector<64x256xf32>
    %41 = arith.cmpf ogt, %39, %40 : vector<64x256xf32>
    %42 = math.exp %39 : vector<64x256xf32>
    %cst_42 = arith.constant 1.000000e+00 : f32
    %43 = vector.broadcast %cst_42 : f32 to vector<64x256xf32>
    %44 = arith.subf %42, %43 : vector<64x256xf32>
    %cst_43 = arith.constant 1.67326319 : f32
    %45 = vector.broadcast %cst_43 : f32 to vector<64x256xf32>
    %46 = arith.mulf %45, %44 : vector<64x256xf32>
    %47 = arith.select %41, %39, %46 : vector<64x256xi1>, vector<64x256xf32>
    %cst_44 = arith.constant 1.05070102 : f32
    %48 = vector.broadcast %cst_44 : f32 to vector<64x256xf32>
    %49 = arith.mulf %48, %47 : vector<64x256xf32>
    %cst_45 = arith.constant 0.000000e+00 : f32
    %50 = vector.broadcast %cst_45 : f32 to vector<8x256xf32>
    %c0_46 = arith.constant 0 : index
    %c0_47 = arith.constant 0 : index
    %51 = vector.load %arg12[%c0_46, %c0_47] : memref<72x256xf32, #tpu.memory_space<vmem>>, vector<8x256xf32>
    tpu.vector_store %arg12[%c0_46, %c0_47], %50 {strides = array<i32>} : memref<72x256xf32, #tpu.memory_space<vmem>>, vector<8x256xf32>,
    %c8_48 = arith.constant 8 : index
    %c0_49 = arith.constant 0 : index
    %52 = vector.load %arg12[%c8_48, %c0_49] : memref<72x256xf32, #tpu.memory_space<vmem>>, vector<64x256xf32>
    tpu.vector_store %arg12[%c8_48, %c0_49], %49 {strides = array<i32>} : memref<72x256xf32, #tpu.memory_space<vmem>>, vector<64x256xf32>,
    %cst_50 = arith.constant 0.000000e+00 : f32
    %53 = vector.broadcast %cst_50 : f32 to vector<64x32xf32>
    %c0_51 = arith.constant 0 : index
    %c0_52 = arith.constant 0 : index
    %54 = vector.load %arg12[%c0_51, %c0_52] : memref<72x256xf32, #tpu.memory_space<vmem>>, vector<64x256xf32>
    %c0_53 = arith.constant 0 : index
    %c0_54 = arith.constant 0 : index
    %c0_55 = arith.constant 0 : index
    %55 = vector.load %arg4[%c0_53, %c0_54, %c0_55] : memref<2x256x32xf32, #tpu.memory_space<vmem>>, vector<1x256x32xf32>
    %56 = vector.shape_cast %55 : vector<1x256x32xf32> to vector<256x32xf32>
    %cst_56 = arith.constant dense<0.000000e+00> : vector<64x32xf32>
    %57 = tpu.matmul %54, %56, %cst_56 {dimension_numbers = #tpu.dot_dimension_numbers<[1], [0], [0], [1], [0, 0, 1, 1], [], []>} : vector<64x256xf32>, vector<256x32xf32>, vector<64x32xf32> -> vector<64x32xf32>
    %58 = arith.addf %53, %57 : vector<64x32xf32>
    %c8_57 = arith.constant 8 : index
    %c0_58 = arith.constant 0 : index
    %59 = vector.load %arg12[%c8_57, %c0_58] : memref<72x256xf32, #tpu.memory_space<vmem>>, vector<64x256xf32>
    %c1_59 = arith.constant 1 : index
    %c0_60 = arith.constant 0 : index
    %c0_61 = arith.constant 0 : index
    %60 = vector.load %arg4[%c1_59, %c0_60, %c0_61] : memref<2x256x32xf32, #tpu.memory_space<vmem>>, vector<1x256x32xf32>
    %61 = vector.shape_cast %60 : vector<1x256x32xf32> to vector<256x32xf32>
    %cst_62 = arith.constant dense<0.000000e+00> : vector<64x32xf32>
    %62 = tpu.matmul %59, %61, %cst_62 {dimension_numbers = #tpu.dot_dimension_numbers<[1], [0], [0], [1], [0, 0, 1, 1], [], []>} : vector<64x256xf32>, vector<256x32xf32>, vector<64x32xf32> -> vector<64x32xf32>
    %63 = arith.addf %58, %62 : vector<64x32xf32>
    %c0_63 = arith.constant 0 : index
    %c0_64 = arith.constant 0 : index
    %64 = vector.load %arg5[%c0_63, %c0_64] : memref<1x32xf32, #tpu.memory_space<vmem>>, vector<1x32xf32>
    %65 = vector.broadcast %64 : vector<1x32xf32> to vector<64x32xf32>
    %66 = arith.addf %63, %65 : vector<64x32xf32>
    %cst_65 = arith.constant 0.000000e+00 : f32
    %67 = vector.broadcast %cst_65 : f32 to vector<64x32xf32>
    %68 = arith.cmpf ogt, %66, %67 : vector<64x32xf32>
    %69 = math.exp %66 : vector<64x32xf32>
    %cst_66 = arith.constant 1.000000e+00 : f32
    %70 = vector.broadcast %cst_66 : f32 to vector<64x32xf32>
    %71 = arith.subf %69, %70 : vector<64x32xf32>
    %cst_67 = arith.constant 1.67326319 : f32
    %72 = vector.broadcast %cst_67 : f32 to vector<64x32xf32>
    %73 = arith.mulf %72, %71 : vector<64x32xf32>
    %74 = arith.select %68, %66, %73 : vector<64x32xi1>, vector<64x32xf32>
    %cst_68 = arith.constant 1.05070102 : f32
    %75 = vector.broadcast %cst_68 : f32 to vector<64x32xf32>
    %76 = arith.mulf %75, %74 : vector<64x32xf32>
    %cst_69 = arith.constant 0.000000e+00 : f32
    %77 = vector.broadcast %cst_69 : f32 to vector<8x8xf32>
    %78 = vector.extract_strided_slice %76 {offsets = [0, 0], sizes = [8, 32], strides = [1, 1]} : vector<64x32xf32> to vector<8x32xf32>
    %c0_70 = arith.constant 0 : index
    %c0_71 = arith.constant 0 : index
    %c0_72 = arith.constant 0 : index
    %79 = vector.load %arg6[%c0_70, %c0_71, %c0_72] : memref<8x32x8xf32, #tpu.memory_space<vmem>>, vector<1x32x8xf32>
    %80 = vector.shape_cast %79 : vector<1x32x8xf32> to vector<32x8xf32>
    %cst_73 = arith.constant dense<0.000000e+00> : vector<8x8xf32>
    %81 = tpu.matmul %78, %80, %cst_73 {dimension_numbers = #tpu.dot_dimension_numbers<[1], [0], [0], [1], [0, 0, 1, 1], [], []>} : vector<8x32xf32>, vector<32x8xf32>, vector<8x8xf32> -> vector<8x8xf32>
    %82 = arith.addf %77, %81 : vector<8x8xf32>
    %83 = vector.extract_strided_slice %76 {offsets = [8, 0], sizes = [8, 32], strides = [1, 1]} : vector<64x32xf32> to vector<8x32xf32>
    %c1_74 = arith.constant 1 : index
    %c0_75 = arith.constant 0 : index
    %c0_76 = arith.constant 0 : index
    %84 = vector.load %arg6[%c1_74, %c0_75, %c0_76] : memref<8x32x8xf32, #tpu.memory_space<vmem>>, vector<1x32x8xf32>
    %85 = vector.shape_cast %84 : vector<1x32x8xf32> to vector<32x8xf32>
    %cst_77 = arith.constant dense<0.000000e+00> : vector<8x8xf32>
    %86 = tpu.matmul %83, %85, %cst_77 {dimension_numbers = #tpu.dot_dimension_numbers<[1], [0], [0], [1], [0, 0, 1, 1], [], []>} : vector<8x32xf32>, vector<32x8xf32>, vector<8x8xf32> -> vector<8x8xf32>
    %87 = arith.addf %82, %86 : vector<8x8xf32>
    %88 = vector.extract_strided_slice %76 {offsets = [16, 0], sizes = [8, 32], strides = [1, 1]} : vector<64x32xf32> to vector<8x32xf32>
    %c2_78 = arith.constant 2 : index
    %c0_79 = arith.constant 0 : index
    %c0_80 = arith.constant 0 : index
    %89 = vector.load %arg6[%c2_78, %c0_79, %c0_80] : memref<8x32x8xf32, #tpu.memory_space<vmem>>, vector<1x32x8xf32>
    %90 = vector.shape_cast %89 : vector<1x32x8xf32> to vector<32x8xf32>
    %cst_81 = arith.constant dense<0.000000e+00> : vector<8x8xf32>
    %91 = tpu.matmul %88, %90, %cst_81 {dimension_numbers = #tpu.dot_dimension_numbers<[1], [0], [0], [1], [0, 0, 1, 1], [], []>} : vector<8x32xf32>, vector<32x8xf32>, vector<8x8xf32> -> vector<8x8xf32>
    %92 = arith.addf %87, %91 : vector<8x8xf32>
    %93 = vector.extract_strided_slice %76 {offsets = [24, 0], sizes = [8, 32], strides = [1, 1]} : vector<64x32xf32> to vector<8x32xf32>
    %c3_82 = arith.constant 3 : index
    %c0_83 = arith.constant 0 : index
    %c0_84 = arith.constant 0 : index
    %94 = vector.load %arg6[%c3_82, %c0_83, %c0_84] : memref<8x32x8xf32, #tpu.memory_space<vmem>>, vector<1x32x8xf32>
    %95 = vector.shape_cast %94 : vector<1x32x8xf32> to vector<32x8xf32>
    %cst_85 = arith.constant dense<0.000000e+00> : vector<8x8xf32>
    %96 = tpu.matmul %93, %95, %cst_85 {dimension_numbers = #tpu.dot_dimension_numbers<[1], [0], [0], [1], [0, 0, 1, 1], [], []>} : vector<8x32xf32>, vector<32x8xf32>, vector<8x8xf32> -> vector<8x8xf32>
    %97 = arith.addf %92, %96 : vector<8x8xf32>
    %98 = vector.extract_strided_slice %76 {offsets = [32, 0], sizes = [8, 32], strides = [1, 1]} : vector<64x32xf32> to vector<8x32xf32>
    %c4_86 = arith.constant 4 : index
    %c0_87 = arith.constant 0 : index
    %c0_88 = arith.constant 0 : index
    %99 = vector.load %arg6[%c4_86, %c0_87, %c0_88] : memref<8x32x8xf32, #tpu.memory_space<vmem>>, vector<1x32x8xf32>
    %100 = vector.shape_cast %99 : vector<1x32x8xf32> to vector<32x8xf32>
    %cst_89 = arith.constant dense<0.000000e+00> : vector<8x8xf32>
    %101 = tpu.matmul %98, %100, %cst_89 {dimension_numbers = #tpu.dot_dimension_numbers<[1], [0], [0], [1], [0, 0, 1, 1], [], []>} : vector<8x32xf32>, vector<32x8xf32>, vector<8x8xf32> -> vector<8x8xf32>
    %102 = arith.addf %97, %101 : vector<8x8xf32>
    %103 = vector.extract_strided_slice %76 {offsets = [40, 0], sizes = [8, 32], strides = [1, 1]} : vector<64x32xf32> to vector<8x32xf32>
    %c5_90 = arith.constant 5 : index
    %c0_91 = arith.constant 0 : index
    %c0_92 = arith.constant 0 : index
    %104 = vector.load %arg6[%c5_90, %c0_91, %c0_92] : memref<8x32x8xf32, #tpu.memory_space<vmem>>, vector<1x32x8xf32>
    %105 = vector.shape_cast %104 : vector<1x32x8xf32> to vector<32x8xf32>
    %cst_93 = arith.constant dense<0.000000e+00> : vector<8x8xf32>
    %106 = tpu.matmul %103, %105, %cst_93 {dimension_numbers = #tpu.dot_dimension_numbers<[1], [0], [0], [1], [0, 0, 1, 1], [], []>} : vector<8x32xf32>, vector<32x8xf32>, vector<8x8xf32> -> vector<8x8xf32>
    %107 = arith.addf %102, %106 : vector<8x8xf32>
    %108 = vector.extract_strided_slice %76 {offsets = [48, 0], sizes = [8, 32], strides = [1, 1]} : vector<64x32xf32> to vector<8x32xf32>
    %c6_94 = arith.constant 6 : index
    %c0_95 = arith.constant 0 : index
    %c0_96 = arith.constant 0 : index
    %109 = vector.load %arg6[%c6_94, %c0_95, %c0_96] : memref<8x32x8xf32, #tpu.memory_space<vmem>>, vector<1x32x8xf32>
    %110 = vector.shape_cast %109 : vector<1x32x8xf32> to vector<32x8xf32>
    %cst_97 = arith.constant dense<0.000000e+00> : vector<8x8xf32>
    %111 = tpu.matmul %108, %110, %cst_97 {dimension_numbers = #tpu.dot_dimension_numbers<[1], [0], [0], [1], [0, 0, 1, 1], [], []>} : vector<8x32xf32>, vector<32x8xf32>, vector<8x8xf32> -> vector<8x8xf32>
    %112 = arith.addf %107, %111 : vector<8x8xf32>
    %113 = vector.extract_strided_slice %76 {offsets = [56, 0], sizes = [8, 32], strides = [1, 1]} : vector<64x32xf32> to vector<8x32xf32>
    %c7_98 = arith.constant 7 : index
    %c0_99 = arith.constant 0 : index
    %c0_100 = arith.constant 0 : index
    %114 = vector.load %arg6[%c7_98, %c0_99, %c0_100] : memref<8x32x8xf32, #tpu.memory_space<vmem>>, vector<1x32x8xf32>
    %115 = vector.shape_cast %114 : vector<1x32x8xf32> to vector<32x8xf32>
    %cst_101 = arith.constant dense<0.000000e+00> : vector<8x8xf32>
    %116 = tpu.matmul %113, %115, %cst_101 {dimension_numbers = #tpu.dot_dimension_numbers<[1], [0], [0], [1], [0, 0, 1, 1], [], []>} : vector<8x32xf32>, vector<32x8xf32>, vector<8x8xf32> -> vector<8x8xf32>
    %117 = arith.addf %112, %116 : vector<8x8xf32>
    %c0_102 = arith.constant 0 : index
    %c0_103 = arith.constant 0 : index
    %118 = vector.load %arg7[%c0_102, %c0_103] : memref<1x8xf32, #tpu.memory_space<vmem>>, vector<1x8xf32>
    %119 = vector.broadcast %118 : vector<1x8xf32> to vector<8x8xf32>
    %120 = arith.addf %117, %119 : vector<8x8xf32>
    %cst_104 = arith.constant 0.000000e+00 : f32
    %121 = vector.broadcast %cst_104 : f32 to vector<8x8xf32>
    %122 = arith.cmpf ogt, %120, %121 : vector<8x8xf32>
    %123 = math.exp %120 : vector<8x8xf32>
    %cst_105 = arith.constant 1.000000e+00 : f32
    %124 = vector.broadcast %cst_105 : f32 to vector<8x8xf32>
    %125 = arith.subf %123, %124 : vector<8x8xf32>
    %cst_106 = arith.constant 1.67326319 : f32
    %126 = vector.broadcast %cst_106 : f32 to vector<8x8xf32>
    %127 = arith.mulf %126, %125 : vector<8x8xf32>
    %128 = arith.select %122, %120, %127 : vector<8x8xi1>, vector<8x8xf32>
    %cst_107 = arith.constant 1.05070102 : f32
    %129 = vector.broadcast %cst_107 : f32 to vector<8x8xf32>
    %130 = arith.mulf %129, %128 : vector<8x8xf32>
    %c0_108 = arith.constant 0 : index
    %c0_109 = arith.constant 0 : index
    %131 = vector.load %arg8[%c0_108, %c0_109] : memref<8x2xf32, #tpu.memory_space<vmem>>, vector<8x2xf32>
    %cst_110 = arith.constant dense<0.000000e+00> : vector<8x2xf32>
    %132 = tpu.matmul %130, %131, %cst_110 {dimension_numbers = #tpu.dot_dimension_numbers<[1], [0], [0], [1], [0, 0, 1, 1], [], []>} : vector<8x8xf32>, vector<8x2xf32>, vector<8x2xf32> -> vector<8x2xf32>
    %c0_111 = arith.constant 0 : index
    %c0_112 = arith.constant 0 : index
    %133 = vector.load %arg9[%c0_111, %c0_112] : memref<1x2xf32, #tpu.memory_space<vmem>>, vector<1x2xf32>
    %134 = vector.broadcast %133 : vector<1x2xf32> to vector<8x2xf32>
    %135 = arith.addf %132, %134 : vector<8x2xf32>
    %cst_113 = arith.constant 0.000000e+00 : f32
    %136 = vector.broadcast %cst_113 : f32 to vector<8x2xf32>
    %137 = arith.cmpf ogt, %135, %136 : vector<8x2xf32>
    %138 = math.exp %135 : vector<8x2xf32>
    %cst_114 = arith.constant 1.000000e+00 : f32
    %139 = vector.broadcast %cst_114 : f32 to vector<8x2xf32>
    %140 = arith.subf %138, %139 : vector<8x2xf32>
    %cst_115 = arith.constant 1.67326319 : f32
    %141 = vector.broadcast %cst_115 : f32 to vector<8x2xf32>
    %142 = arith.mulf %141, %140 : vector<8x2xf32>
    %143 = arith.select %137, %135, %142 : vector<8x2xi1>, vector<8x2xf32>
    %cst_116 = arith.constant 1.05070102 : f32
    %144 = vector.broadcast %cst_116 : f32 to vector<8x2xf32>
    %145 = arith.mulf %144, %143 : vector<8x2xf32>
    %c0_117 = arith.constant 0 : index
    %c0_118 = arith.constant 0 : index
    %146 = vector.load %arg10[%c0_117, %c0_118] : memref<8x2xf32, #tpu.memory_space<vmem>>, vector<8x2xf32>
    tpu.vector_store %arg10[%c0_117, %c0_118], %145 {strides = array<i32>} : memref<8x2xf32, #tpu.memory_space<vmem>>, vector<8x2xf32>,
    return
  }
  func.func @transform_0(%arg0: i32) -> (i32, i32, i32) {
    %c0_i32 = arith.constant 0 : i32
    %c0_i32_0 = arith.constant 0 : i32
    %c0_i32_1 = arith.constant 0 : i32
    return %c0_i32, %arg0, %c0_i32_0 : i32, i32, i32
  }
  func.func @transform_1(%arg0: i32) -> (i32, i32, i32) {
    %c0_i32 = arith.constant 0 : i32
    %c0_i32_0 = arith.constant 0 : i32
    %c0_i32_1 = arith.constant 0 : i32
    %c0_i32_2 = arith.constant 0 : i32
    return %c0_i32, %c0_i32_0, %c0_i32_1 : i32, i32, i32
  }
  func.func @transform_2(%arg0: i32) -> (i32, i32) {
    %c0_i32 = arith.constant 0 : i32
    %c0_i32_0 = arith.constant 0 : i32
    %c0_i32_1 = arith.constant 0 : i32
    return %c0_i32, %c0_i32_0 : i32, i32
  }
  func.func @transform_3(%arg0: i32) -> (i32, i32, i32) {
    %c0_i32 = arith.constant 0 : i32
    %c0_i32_0 = arith.constant 0 : i32
    %c0_i32_1 = arith.constant 0 : i32
    %c0_i32_2 = arith.constant 0 : i32
    return %c0_i32, %c0_i32_0, %c0_i32_1 : i32, i32, i32
  }
  func.func @transform_4(%arg0: i32) -> (i32, i32) {
    %c0_i32 = arith.constant 0 : i32
    %c0_i32_0 = arith.constant 0 : i32
    %c0_i32_1 = arith.constant 0 : i32
    return %c0_i32, %c0_i32_0 : i32, i32
  }
  func.func @transform_5(%arg0: i32) -> (i32, i32, i32) {
    %c0_i32 = arith.constant 0 : i32
    %c0_i32_0 = arith.constant 0 : i32
    %c0_i32_1 = arith.constant 0 : i32
    %c0_i32_2 = arith.constant 0 : i32
    return %c0_i32, %c0_i32_0, %c0_i32_1 : i32, i32, i32
  }
  func.func @transform_6(%arg0: i32) -> (i32, i32) {
    %c0_i32 = arith.constant 0 : i32
    %c0_i32_0 = arith.constant 0 : i32
    %c0_i32_1 = arith.constant 0 : i32
    return %c0_i32, %c0_i32_0 : i32, i32
  }
  func.func @transform_7(%arg0: i32) -> (i32, i32) {
    %c0_i32 = arith.constant 0 : i32
    %c0_i32_0 = arith.constant 0 : i32
    %c0_i32_1 = arith.constant 0 : i32
    return %c0_i32, %c0_i32_0 : i32, i32
  }
  func.func @transform_8(%arg0: i32) -> (i32, i32) {
    %c0_i32 = arith.constant 0 : i32
    %c0_i32_0 = arith.constant 0 : i32
    %c0_i32_1 = arith.constant 0 : i32
    return %c0_i32, %c0_i32_0 : i32, i32
  }
  func.func @transform_9(%arg0: i32) -> (i32, i32) {
    %c0_i32 = arith.constant 0 : i32
    %c0_i32_0 = arith.constant 0 : i32
    return %arg0, %c0_i32 : i32, i32
  }
}

</mosaic_0001>

<bundles_post_ra>
// kernel: generate_decoder_forward.1
= control target key start
LH: loop header
LB: loop body
LE: loop exit
PB: predicated region body
PF: predicated region fallthrough
CT: control target
= control target key end

     0   :  { %s3273_s1 = inlined_call_operand.vmem [shape: f32[2,384,256], index: 1, kind: input, shape index: {}]   ;;  %s3274_s0 = inlined_call_operand.vmem [shape: f32[8,8,384], index: 0, kind: input, shape index: {}]   ;;  %s3275_s3 = inlined_call_operand.vmem [shape: f32[2,256,32], index: 3, kind: input, shape index: {}]   ;;  %s3276_s2 = inlined_call_operand.vmem [shape: f32[1,256], index: 2, kind: input, shape index: {}]   ;;  %s3277_s4 = inlined_call_operand.vmem [shape: f32[1,32], index: 4, kind: input, shape index: {}]   ;;  %s3278_s5 = inlined_call_operand.vmem [shape: f32[8,32,8], index: 5, kind: input, shape index: {}]   ;;  %s3279_s6 = inlined_call_operand.vmem [shape: f32[1,8], index: 6, kind: input, shape index: {}]   ;;  %s3280_s8 = inlined_call_operand.vmem [shape: f32[1,2], index: 8, kind: input, shape index: {}]   ;;  %s3281_s7 = inlined_call_operand.vmem [shape: f32[8,2], index: 7, kind: input, shape index: {}]   ;;  %s3282_s9 = inlined_call_operand.vmem [shape: f32[8,2], index: 9, kind: output, shape index: {}]  }
   0x1   :  { %v1639_v0 = vld [vmem:[%s3273_s1 + $0x3f0] sm:$0xff]  ;;  %v1637_v3 = vld [vmem:[%s3273_s1 + $0x3e0] sm:$0xff]  ;;  %v1640_v6 = vld [vmem:[%s3273_s1 + $0x3f8] sm:$0xff] }
   0x2   :  { %v1671_v1 = vld [vmem:[%s3273_s1 + $0x4f0] sm:$0xff]  ;;  %331 = vmatpush.msra.mxu0 %v1639_v0  ;;  %v1669_v4 = vld [vmem:[%s3273_s1 + $0x4e0] sm:$0xff]  ;;  %v1638_v10 = vld [vmem:[%s3273_s1 + $0x3e8] sm:$0xff]  ;;  %454 = vmatpush.msra.mxu3 %v1640_v6 }
   0x3   :  { %v1703_v2 = vld [vmem:[%s3273_s1 + $0x5f0] sm:$0xff]  ;;  %372 = vmatpush.msra.mxu1 %v1671_v1  ;;  %v1701_v5 = vld [vmem:[%s3273_s1 + $0x5e0] sm:$0xff]  ;;  %v1636_v14 = vld [vmem:[%s3273_s1 + $0x3d8] sm:$0xff] }
   0x4   :  { %413 = vmatpush.msra.mxu2 %v1703_v2  ;;  %v1635_v7 = vld [vmem:[%s3273_s1 + $0x3d0] sm:$0xff]  ;;  %332 = vmatpush.msra.mxu0 %v1637_v3  ;;  %v1633_v11 = vld [vmem:[%s3273_s1 + $0x3c0] sm:$0xff]  ;;  %v1634_v18 = vld [vmem:[%s3273_s1 + $0x3c8] sm:$0xff] }
   0x5   :  { %v1667_v8 = vld [vmem:[%s3273_s1 + $0x4d0] sm:$0xff]  ;;  %373 = vmatpush.msra.mxu1 %v1669_v4  ;;  %v1665_v12 = vld [vmem:[%s3273_s1 + $0x4c0] sm:$0xff]  ;;  %455 = vmatpush.msra.mxu3 %v1638_v10  ;;  %v1632_v22 = vld [vmem:[%s3273_s1 + $0x3b8] sm:$0xff] }
   0x6   :  { %v1699_v9 = vld [vmem:[%s3273_s1 + $0x5d0] sm:$0xff]  ;;  %414 = vmatpush.msra.mxu2 %v1701_v5  ;;  %333 = vmatpush.msra.mxu0 %v1635_v7  ;;  %v1697_v13 = vld [vmem:[%s3273_s1 + $0x5c0] sm:$0xff]  ;;  %v1630_v26 = vld [vmem:[%s3273_s1 + $0x3a8] sm:$0xff] }
   0x7   :  { %374 = vmatpush.msra.mxu1 %v1667_v8  ;;  %v1631_v15 = vld [vmem:[%s3273_s1 + $0x3b0] sm:$0xff]  ;;  %456 = vmatpush.msra.mxu3 %v1636_v14  ;;  %v1629_v19 = vld [vmem:[%s3273_s1 + $0x3a0] sm:$0xff]  ;;  %v1628_v30 = vld [vmem:[%s3273_s1 + $0x398] sm:$0xff] }
   0x8   :  { %415 = vmatpush.msra.mxu2 %v1699_v9  ;;  %v1663_v16 = vld [vmem:[%s3273_s1 + $0x4b0] sm:$0xff]  ;;  %334 = vmatpush.msra.mxu0 %v1633_v11  ;;  %v1661_v20 = vld [vmem:[%s3273_s1 + $0x4a0] sm:$0xff]  ;;  %v1626_v34 = vld [vmem:[%s3273_s1 + $0x388] sm:$0xff] }
   0x9   :  { %375 = vmatpush.msra.mxu1 %v1665_v12  ;;  %v1695_v17 = vld [vmem:[%s3273_s1 + $0x5b0] sm:$0xff]  ;;  %v1693_v21 = vld [vmem:[%s3273_s1 + $0x5a0] sm:$0xff]  ;;  %457 = vmatpush.msra.mxu3 %v1634_v18  ;;  %v1624_v38 = vld [vmem:[%s3273_s1 + $0x378] sm:$0xff] }
   0xa   :  { %416 = vmatpush.msra.mxu2 %v1697_v13  ;;  %335 = vmatpush.msra.mxu0 %v1631_v15  ;;  %v1627_v23 = vld [vmem:[%s3273_s1 + $0x390] sm:$0xff]  ;;  %v1625_v27 = vld [vmem:[%s3273_s1 + $0x380] sm:$0xff]  ;;  %v1622_v42 = vld [vmem:[%s3273_s1 + $0x368] sm:$0xff] }
   0xb   :  { %376 = vmatpush.msra.mxu1 %v1663_v16  ;;  %v1659_v24 = vld [vmem:[%s3273_s1 + $0x490] sm:$0xff]  ;;  %458 = vmatpush.msra.mxu3 %v1632_v22  ;;  %v1657_v28 = vld [vmem:[%s3273_s1 + $0x480] sm:$0xff]  ;;  %v1620_v46 = vld [vmem:[%s3273_s1 + $0x358] sm:$0xff] }
   0xc   :  { %417 = vmatpush.msra.mxu2 %v1695_v17  ;;  %336 = vmatpush.msra.mxu0 %v1629_v19  ;;  %v1691_v25 = vld [vmem:[%s3273_s1 + $0x590] sm:$0xff]  ;;  %v1689_v29 = vld [vmem:[%s3273_s1 + $0x580] sm:$0xff]  ;;  %v1618_v50 = vld [vmem:[%s3273_s1 + $0x348] sm:$0xff] }
   0xd   :  { %377 = vmatpush.msra.mxu1 %v1661_v20  ;;  %459 = vmatpush.msra.mxu3 %v1630_v26  ;;  %v1623_v31 = vld [vmem:[%s3273_s1 + $0x370] sm:$0xff]  ;;  %v1621_v35 = vld [vmem:[%s3273_s1 + $0x360] sm:$0xff]  ;;  %v1616_v54 = vld [vmem:[%s3273_s1 + $0x338] sm:$0xff] }
   0xe   :  { %418 = vmatpush.msra.mxu2 %v1693_v21  ;;  %337 = vmatpush.msra.mxu0 %v1627_v23  ;;  %v1655_v32 = vld [vmem:[%s3273_s1 + $0x470] sm:$0xff]  ;;  %v1653_v36 = vld [vmem:[%s3273_s1 + $0x460] sm:$0xff]  ;;  %v1614_v58 = vld [vmem:[%s3273_s1 + $0x328] sm:$0xff] }
   0xf   :  { %378 = vmatpush.msra.mxu1 %v1659_v24  ;;  %v1687_v33 = vld [vmem:[%s3273_s1 + $0x570] sm:$0xff]  ;;  %460 = vmatpush.msra.mxu3 %v1628_v30  ;;  %v1685_v37 = vld [vmem:[%s3273_s1 + $0x560] sm:$0xff]  ;;  %v1612_v62 = vld [vmem:[%s3273_s1 + $0x318] sm:$0xff] }
  0x10   :  { %419 = vmatpush.msra.mxu2 %v1691_v25  ;;  %338 = vmatpush.msra.mxu0 %v1625_v27  ;;  %v1619_v39 = vld [vmem:[%s3273_s1 + $0x350] sm:$0xff]  ;;  %v1617_v43 = vld [vmem:[%s3273_s1 + $0x340] sm:$0xff]  ;;  %v2104_v0 = vld [vmem:[%s3274_s0 + $0x8] sm:$0xff] }
  0x11   :  { %379 = vmatpush.msra.mxu1 %v1657_v28  ;;  %461 = vmatpush.msra.mxu3 %v1626_v34  ;;  %v1651_v40 = vld [vmem:[%s3273_s1 + $0x450] sm:$0xff]  ;;  %v1649_v44 = vld [vmem:[%s3273_s1 + $0x440] sm:$0xff]  ;;  %v1610_v2 = vld [vmem:[%s3273_s1 + $0x308] sm:$0xff] }
  0x12   :  { %420 = vmatpush.msra.mxu2 %v1689_v29  ;;  %339 = vmatpush.msra.mxu0 %v1623_v31  ;;  %v1683_v41 = vld [vmem:[%s3273_s1 + $0x550] sm:$0xff]  ;;  %v1681_v45 = vld [vmem:[%s3273_s1 + $0x540] sm:$0xff]  ;;  %v1704_v5 = vld [vmem:[%s3273_s1 + $0x5f8] sm:$0xff] }
  0x13   :  { %380 = vmatpush.msra.mxu1 %v1655_v32  ;;  %462 = vmatpush.msra.mxu3 %v1624_v38  ;;  %v1615_v47 = vld [vmem:[%s3273_s1 + $0x330] sm:$0xff]  ;;  %v1613_v51 = vld [vmem:[%s3273_s1 + $0x320] sm:$0xff]  ;;  %v1672_v7 = vld [vmem:[%s3273_s1 + $0x4f8] sm:$0xff] }
  0x14   :  { %421 = vmatpush.msra.mxu2 %v1687_v33  ;;  %340 = vmatpush.msra.mxu0 %v1621_v35  ;;  %v1647_v48 = vld [vmem:[%s3273_s1 + $0x430] sm:$0xff]  ;;  %v1645_v52 = vld [vmem:[%s3273_s1 + $0x420] sm:$0xff]  ;;  %v1702_v9 = vld [vmem:[%s3273_s1 + $0x5e8] sm:$0xff] }
  0x15   :  { %381 = vmatpush.msra.mxu1 %v1653_v36  ;;  %463 = vmatpush.msra.mxu3 %v1622_v42  ;;  %v1679_v49 = vld [vmem:[%s3273_s1 + $0x530] sm:$0xff]  ;;  %v1677_v53 = vld [vmem:[%s3273_s1 + $0x520] sm:$0xff]  ;;  %v1670_v11 = vld [vmem:[%s3273_s1 + $0x4e8] sm:$0xff] }
  0x16   :  { %422 = vmatpush.msra.mxu2 %v1685_v37  ;;  %341 = vmatpush.msra.mxu0 %v1619_v39  ;;  %v1611_v55 = vld [vmem:[%s3273_s1 + $0x310] sm:$0xff]  ;;  %v1609_v59 = vld [vmem:[%s3273_s1 + $0x300] sm:$0xff]  ;;  %v1700_v13 = vld [vmem:[%s3273_s1 + $0x5d8] sm:$0xff] }
  0x17   :  { %382 = vmatpush.msra.mxu1 %v1651_v40  ;;  %464 = vmatpush.msra.mxu3 %v1620_v46  ;;  %v1643_v56 = vld [vmem:[%s3273_s1 + $0x410] sm:$0xff]  ;;  %v1641_v60 = vld [vmem:[%s3273_s1 + $0x400] sm:$0xff]  ;;  %v2154_v14 = vld [vmem:[%s3274_s0 + $0x18] sm:$0xff] }
  0x18   :  { %423 = vmatpush.msra.mxu2 %v1683_v41  ;;  %342 = vmatpush.msra.mxu0 %v1617_v43  ;;  %v1675_v57 = vld [vmem:[%s3273_s1 + $0x510] sm:$0xff]  ;;  %v1673_v61 = vld [vmem:[%s3273_s1 + $0x500] sm:$0xff]  ;;  %v2164_v16 = vld [vmem:[%s3274_s0 + $0x28] sm:$0xff] }
  0x19   :  { %383 = vmatpush.msra.mxu1 %v1649_v44  ;;  %465 = vmatpush.msra.mxu3 %v1618_v50  ;;  %v2099_v63 = vld [vmem:[%s3274_s0] sm:$0xff]  ;;  %v2109_v1 = vld [vmem:[%s3274_s0 + $0x10] sm:$0xff]  ;;  %v1668_v19 = vld [vmem:[%s3273_s1 + $0x4d8] sm:$0xff] }
  0x1a   :  { %424 = vmatpush.msra.mxu2 %v1681_v45  ;;  %343 = vmatpush.msra.mxu0 %v1615_v47  ;;  %v144_v3 = vld [vmem:[%s3273_s1 + $0xf0] sm:$0xff]  ;;  %v142_v6 = vld [vmem:[%s3273_s1 + $0xe0] sm:$0xff]  ;;  %v1698_v20 = vld [vmem:[%s3273_s1 + $0x5c8] sm:$0xff] }
  0x1b   :  { %384 = vmatpush.msra.mxu1 %v1647_v48  ;;  %466 = vmatpush.msra.mxu3 %v1616_v54  ;;  %v176_v4 = vld [vmem:[%s3273_s1 + $0x1f0] sm:$0xff]  ;;  %v174_v8 = vld [vmem:[%s3273_s1 + $0x1e0] sm:$0xff]  ;;  %v1666_v23 = vld [vmem:[%s3273_s1 + $0x4c8] sm:$0xff] }
  0x1c   :  { %425 = vmatpush.msra.mxu2 %v1679_v49  ;;  %344 = vmatpush.msra.mxu0 %v1613_v51  ;;  %v140_v10 = vld [vmem:[%s3273_s1 + $0xd0] sm:$0xff]  ;;  %v2159_v15 = vld [vmem:[%s3274_s0 + $0x20] sm:$0xff]  ;;  %v1696_v24 = vld [vmem:[%s3273_s1 + $0x5b8] sm:$0xff] }
  0x1d   :  { %385 = vmatpush.msra.mxu1 %v1645_v52  ;;  %467 = vmatpush.msra.mxu3 %v1614_v58  ;;  %v172_v12 = vld [vmem:[%s3273_s1 + $0x1d0] sm:$0xff]  ;;  %v170_v17 = vld [vmem:[%s3273_s1 + $0x1c0] sm:$0xff]  ;;  %v1664_v27 = vld [vmem:[%s3273_s1 + $0x4b8] sm:$0xff] }
  0x1e   :  { %426 = vmatpush.msra.mxu2 %v1677_v53  ;;  %345 = vmatpush.msra.mxu0 %v1611_v55  ;;  %v138_v18 = vld [vmem:[%s3273_s1 + $0xc0] sm:$0xff]  ;;  %v136_v21 = vld [vmem:[%s3273_s1 + $0xb0] sm:$0xff]  ;;  %v1694_v28 = vld [vmem:[%s3273_s1 + $0x5a8] sm:$0xff] }
  0x1f   :  { %386 = vmatpush.msra.mxu1 %v1643_v56  ;;  %468 = vmatpush.msra.mxu3 %v1612_v62  ;;  %v168_v22 = vld [vmem:[%s3273_s1 + $0x1b0] sm:$0xff]  ;;  %v134_v25 = vld [vmem:[%s3273_s1 + $0xa0] sm:$0xff]  ;;  %v2214_v30 = vld [vmem:[%s3274_s0 + $0x38] sm:$0xff] }
  0x20   :  { %427 = vmatpush.msra.mxu2 %v1675_v57  ;;  %346 = vmatpush.msra.mxu0 %v1609_v59  ;;  %v166_v26 = vld [vmem:[%s3273_s1 + $0x1a0] sm:$0xff]  ;;  %v2209_v29 = vld [vmem:[%s3274_s0 + $0x30] sm:$0xff]  ;;  %v1662_v34 = vld [vmem:[%s3273_s1 + $0x4a8] sm:$0xff] }
  0x21   :  { %387 = vmatpush.msra.mxu1 %v1641_v60  ;;  %347 = vmatmul.f32.vlgmr.msra.gmra.mxu0 %v2099_v63  ;;  %v2219_v31 = vld [vmem:[%s3274_s0 + $0x40] sm:$0xff]  ;;  %v164_v32 = vld [vmem:[%s3273_s1 + $0x190] sm:$0xff]  ;;  %v1692_v35 = vld [vmem:[%s3273_s1 + $0x598] sm:$0xff] }
  0x22   :  { %428 = vmatpush.msra.mxu2 %v1673_v61  ;;  %388 = vmatmul.f32.vlgmr.msra.gmra.mxu1 %v2104_v0  ;;  %v132_v33 = vld [vmem:[%s3273_s1 + $0x90] sm:$0xff]  ;;  %v130_v36 = vld [vmem:[%s3273_s1 + $0x80] sm:$0xff]  ;;  %v1660_v38 = vld [vmem:[%s3273_s1 + $0x498] sm:$0xff] }
  0x23   :  { %429 = vmatmul.f32.vlgmr.msra.gmra.mxu2 %v2109_v1  ;;  %469 = vmatpush.msra.mxu3 %v1610_v2  ;;  %v162_v37 = vld [vmem:[%s3273_s1 + $0x180] sm:$0xff]  ;;  %v1690_v39 = vld [vmem:[%s3273_s1 + $0x588] sm:$0xff]  ;;  %v128_v40 = vld [vmem:[%s3273_s1 + $0x70] sm:$0xff] }
  0x24   :  { %577 = vmatpush.msrb.mxu2 %v144_v3  ;;  %470 = vmatmul.f32.vlgmr.msra.gmra.mxu3 %v2099_v63  ;;  %v160_v41 = vld [vmem:[%s3273_s1 + $0x170] sm:$0xff]  ;;  %v1658_v42 = vld [vmem:[%s3273_s1 + $0x488] sm:$0xff]  ;;  %v1688_v43 = vld [vmem:[%s3273_s1 + $0x578] sm:$0xff] }
  0x25   :  { %618 = vmatpush.msrb.mxu3 %v176_v4  ;;  %536 = vmatpush.msrb.mxu1 %v1704_v5  ;;  %v2264_v44 = vld [vmem:[%s3274_s0 + $0x48] sm:$0xff]  ;;  %v2269_v45 = vld [vmem:[%s3274_s0 + $0x50] sm:$0xff]  ;;  %v2274_v46 = vld [vmem:[%s3274_s0 + $0x58] sm:$0xff] }
  0x26   :  { %578 = vmatpush.msrb.mxu2 %v142_v6  ;;  %495 = vmatpush.msrb.mxu0 %v1672_v7  ;;  %v158_v47 = vld [vmem:[%s3273_s1 + $0x160] sm:$0xff]  ;;  %v1656_v49 = vld [vmem:[%s3273_s1 + $0x478] sm:$0xff]  ;;  %v1686_v50 = vld [vmem:[%s3273_s1 + $0x568] sm:$0xff] }
  0x27   :  { %619 = vmatpush.msrb.mxu3 %v174_v8  ;;  %537 = vmatpush.msrb.mxu1 %v1702_v9  ;;  %v126_v48 = vld [vmem:[%s3273_s1 + $0x60] sm:$0xff]  ;;  %v124_v51 = vld [vmem:[%s3273_s1 + $0x50] sm:$0xff]  ;;  %v1654_v53 = vld [vmem:[%s3273_s1 + $0x468] sm:$0xff] }
  0x28   :  { %579 = vmatpush.msrb.mxu2 %v140_v10  ;;  %496 = vmatpush.msrb.mxu0 %v1670_v11  ;;  %v156_v52 = vld [vmem:[%s3273_s1 + $0x150] sm:$0xff]  ;;  %v1684_v54 = vld [vmem:[%s3273_s1 + $0x558] sm:$0xff]  ;;  %v122_v55 = vld [vmem:[%s3273_s1 + $0x40] sm:$0xff] }
  0x29   :  { %620 = vmatpush.msrb.mxu3 %v172_v12  ;;  %538 = vmatpush.msrb.mxu1 %v1700_v13  ;;  %v154_v56 = vld [vmem:[%s3273_s1 + $0x140] sm:$0xff]  ;;  %v1652_v57 = vld [vmem:[%s3273_s1 + $0x458] sm:$0xff]  ;;  %v1682_v58 = vld [vmem:[%s3273_s1 + $0x548] sm:$0xff] }
  0x2a   :  { %350 = vmatmul.f32.gmra.mxu0 %v2154_v14  ;;  %391 = vmatmul.f32.gmra.mxu1 %v2159_v15  ;;  %v2319_v59 = vld [vmem:[%s3274_s0 + $0x60] sm:$0xff]  ;;  %v2324_v60 = vld [vmem:[%s3274_s0 + $0x68] sm:$0xff]  ;;  %v2329_v61 = vld [vmem:[%s3274_s0 + $0x70] sm:$0xff] }
  0x2b   :  { %432 = vmatmul.f32.gmra.mxu2 %v2164_v16  ;;  %621 = vmatpush.msrb.mxu3 %v170_v17  ;;  %v152_v62 = vld [vmem:[%s3273_s1 + $0x130] sm:$0xff]  ;;  %v1650_v3 = vld [vmem:[%s3273_s1 + $0x448] sm:$0xff]  ;;  %v1680_v4 = vld [vmem:[%s3273_s1 + $0x538] sm:$0xff] }
  0x2c   :  { %473 = vmatmul.f32.gmra.mxu3 %v2154_v14  ;;  %580 = vmatpush.msrb.mxu2 %v138_v18  ;;  %v120_v2 = vld [vmem:[%s3273_s1 + $0x30] sm:$0xff]  ;;  %v118_v5 = vld [vmem:[%s3273_s1 + $0x20] sm:$0xff]  ;;  %v1648_v7 = vld [vmem:[%s3273_s1 + $0x438] sm:$0xff] }
  0x2d   :  { %497 = vmatpush.msrb.mxu0 %v1668_v19  ;;  %539 = vmatpush.msrb.mxu1 %v1698_v20  ;;  %v150_v6 = vld [vmem:[%s3273_s1 + $0x120] sm:$0xff]  ;;  %v1678_v8 = vld [vmem:[%s3273_s1 + $0x528] sm:$0xff]  ;;  %v116_v9 = vld [vmem:[%s3273_s1 + $0x10] sm:$0xff] }
  0x2e   :  { %581 = vmatpush.msrb.mxu2 %v136_v21  ;;  %622 = vmatpush.msrb.mxu3 %v168_v22  ;;  %v148_v10 = vld [vmem:[%s3273_s1 + $0x110] sm:$0xff]  ;;  %v1646_v11 = vld [vmem:[%s3273_s1 + $0x428] sm:$0xff]  ;;  %v1676_v12 = vld [vmem:[%s3273_s1 + $0x518] sm:$0xff] }
  0x2f   :  { %498 = vmatpush.msrb.mxu0 %v1666_v23  ;;  %540 = vmatpush.msrb.mxu1 %v1696_v24  ;;  %v2374_v13 = vld [vmem:[%s3274_s0 + $0x78] sm:$0xff]  ;;  %v2379_v17 = vld [vmem:[%s3274_s0 + $0x80] sm:$0xff]  ;;  %v2384_v18 = vld [vmem:[%s3274_s0 + $0x88] sm:$0xff] }
  0x30   :  { %582 = vmatpush.msrb.mxu2 %v134_v25  ;;  %623 = vmatpush.msrb.mxu3 %v166_v26  ;;  %v1644_v19 = vld [vmem:[%s3273_s1 + $0x418] sm:$0xff]  ;;  %v114_v20 = vld [vmem:[%s3273_s1] sm:$0xff]  ;;  %v1642_v22 = vld [vmem:[%s3273_s1 + $0x408] sm:$0xff] }
  0x31   :  { %499 = vmatpush.msrb.mxu0 %v1664_v27  ;;  %541 = vmatpush.msrb.mxu1 %v1694_v28  ;;  %v146_v21 = vld [vmem:[%s3273_s1 + $0x100] sm:$0xff]  ;;  %v1674_v23 = vld [vmem:[%s3273_s1 + $0x508] sm:$0xff]  ;;  %v177_v24 = vld [vmem:[%s3273_s1 + $0x1f8] sm:$0xff] }
  0x32   :  { %353 = vmatmul.f32.gmra.mxu0 %v2209_v29  ;;  %394 = vmatmul.f32.gmra.mxu1 %v2214_v30  ;;  %v209_v25 = vld [vmem:[%s3273_s1 + $0x2f8] sm:$0xff]  ;;  %v175_v27 = vld [vmem:[%s3273_s1 + $0x1e8] sm:$0xff]  ;;  %v208_v28 = vld [vmem:[%s3273_s1 + $0x2f0] sm:$0xff] }
  0x33   :  { %435 = vmatmul.f32.gmra.mxu2 %v2219_v31  ;;  %624 = vmatpush.msrb.mxu3 %v164_v32  ;;  %v145_v26 = vld [vmem:[%s3273_s1 + $0xf8] sm:$0xff]  ;;  %v207_v32 = vld [vmem:[%s3273_s1 + $0x2e8] sm:$0xff] }
  0x34   :  { %476 = vmatmul.f32.gmra.mxu3 %v2209_v29  ;;  %583 = vmatpush.msrb.mxu2 %v132_v33  ;;  %v143_v33 = vld [vmem:[%s3273_s1 + $0xe8] sm:$0xff] }
  0x35   :  { %500 = vmatpush.msrb.mxu0 %v1662_v34  ;;  %542 = vmatpush.msrb.mxu1 %v1692_v35  ;;  %v2429_v34 = vld [vmem:[%s3274_s0 + $0x90] sm:$0xff]  ;;  %v2434_v35 = vld [vmem:[%s3274_s0 + $0x98] sm:$0xff] }
  0x36   :  { %584 = vmatpush.msrb.mxu2 %v130_v36  ;;  %625 = vmatpush.msrb.mxu3 %v162_v37  ;;  %v2439_v36 = vld [vmem:[%s3274_s0 + $0xa0] sm:$0xff]  ;;  %v205_v37 = vld [vmem:[%s3273_s1 + $0x2d8] sm:$0xff] }
  0x37   :  { %501 = vmatpush.msrb.mxu0 %v1660_v38  ;;  %543 = vmatpush.msrb.mxu1 %v1690_v39  ;;  %v173_v38 = vld [vmem:[%s3273_s1 + $0x1d8] sm:$0xff]  ;;  %v206_v39 = vld [vmem:[%s3273_s1 + $0x2e0] sm:$0xff] }
  0x38   :  { %585 = vmatpush.msrb.mxu2 %v128_v40  ;;  %626 = vmatpush.msrb.mxu3 %v160_v41  ;;  %v141_v40 = vld [vmem:[%s3273_s1 + $0xd8] sm:$0xff]  ;;  %v171_v41 = vld [vmem:[%s3273_s1 + $0x1c8] sm:$0xff] }
  0x39   :  { %502 = vmatpush.msrb.mxu0 %v1658_v42  ;;  %544 = vmatpush.msrb.mxu1 %v1688_v43  ;;  %v203_v42 = vld [vmem:[%s3273_s1 + $0x2c8] sm:$0xff]  ;;  %v204_v43 = vld [vmem:[%s3273_s1 + $0x2d0] sm:$0xff] }
  0x3a   :  { %356 = vmatmul.f32.gmra.mxu0 %v2264_v44  ;;  %397 = vmatmul.f32.gmra.mxu1 %v2269_v45 }
  0x3b   :  { %438 = vmatmul.f32.gmra.mxu2 %v2274_v46  ;;  %627 = vmatpush.msrb.mxu3 %v158_v47  ;;  %v139_v47 = vld [vmem:[%s3273_s1 + $0xc8] sm:$0xff] }
  0x3c   :  { %479 = vmatmul.f32.gmra.mxu3 %v2264_v44  ;;  %586 = vmatpush.msrb.mxu2 %v126_v48  ;;  %v169_v48 = vld [vmem:[%s3273_s1 + $0x1b8] sm:$0xff] }
  0x3d   :  { %503 = vmatpush.msrb.mxu0 %v1656_v49  ;;  %545 = vmatpush.msrb.mxu1 %v1686_v50  ;;  %v201_v49 = vld [vmem:[%s3273_s1 + $0x2b8] sm:$0xff]  ;;  %v202_v50 = vld [vmem:[%s3273_s1 + $0x2c0] sm:$0xff] }
  0x3e   :  { %587 = vmatpush.msrb.mxu2 %v124_v51  ;;  %628 = vmatpush.msrb.mxu3 %v156_v52  ;;  %v137_v51 = vld [vmem:[%s3273_s1 + $0xb8] sm:$0xff]  ;;  %v1606_v52 = vld [vmem:[%s3274_s0 + $0xa8] sm:$0xff] }
  0x3f   :  { %504 = vmatpush.msrb.mxu0 %v1654_v53  ;;  %546 = vmatpush.msrb.mxu1 %v1684_v54  ;;  %v2487_v53 = vld [vmem:[%s3274_s0 + $0xb0] sm:$0xff]  ;;  %v2492_v54 = vld [vmem:[%s3274_s0 + $0xb8] sm:$0xff] }
  0x40   :  { %588 = vmatpush.msrb.mxu2 %v122_v55  ;;  %629 = vmatpush.msrb.mxu3 %v154_v56  ;;  %v199_v55 = vld [vmem:[%s3273_s1 + $0x2a8] sm:$0xff] }
  0x41   :  { %505 = vmatpush.msrb.mxu0 %v1652_v57  ;;  %547 = vmatpush.msrb.mxu1 %v1682_v58  ;;  %v167_v56 = vld [vmem:[%s3273_s1 + $0x1a8] sm:$0xff]  ;;  %v200_v57 = vld [vmem:[%s3273_s1 + $0x2b0] sm:$0xff] }
  0x42   :  { %359 = vmatmul.f32.gmra.mxu0 %v2319_v59  ;;  %400 = vmatmul.f32.gmra.mxu1 %v2324_v60  ;;  %v135_v58 = vld [vmem:[%s3273_s1 + $0xa8] sm:$0xff] }
  0x43   :  { %441 = vmatmul.f32.gmra.mxu2 %v2329_v61  ;;  %630 = vmatpush.msrb.mxu3 %v152_v62  ;;  %v165_v62 = vld [vmem:[%s3273_s1 + $0x198] sm:$0xff] }
  0x44   :  { %482 = vmatmul.f32.gmra.mxu3 %v2319_v59  ;;  %589 = vmatpush.msrb.mxu2 %v120_v2  ;;  %v197_v2 = vld [vmem:[%s3273_s1 + $0x298] sm:$0xff] }
  0x45   :  { %506 = vmatpush.msrb.mxu0 %v1650_v3  ;;  %548 = vmatpush.msrb.mxu1 %v1680_v4  ;;  %v198_v3 = vld [vmem:[%s3273_s1 + $0x2a0] sm:$0xff]  ;;  %v133_v4 = vld [vmem:[%s3273_s1 + $0x98] sm:$0xff] }
  0x46   :  { %590 = vmatpush.msrb.mxu2 %v118_v5  ;;  %631 = vmatpush.msrb.mxu3 %v150_v6  ;;  %v163_v5 = vld [vmem:[%s3273_s1 + $0x188] sm:$0xff] }
  0x47   :  { %507 = vmatpush.msrb.mxu0 %v1648_v7  ;;  %549 = vmatpush.msrb.mxu1 %v1678_v8  ;;  %v195_v6 = vld [vmem:[%s3273_s1 + $0x288] sm:$0xff]  ;;  %v3283_v7 = vmov 0.0   ;;  %v196_v8 = vld [vmem:[%s3273_s1 + $0x290] sm:$0xff] }
  0x48   :  { %591 = vmatpush.msrb.mxu2 %v116_v9  ;;  %632 = vmatpush.msrb.mxu3 %v148_v10  ;;  %v131_v9 = vld [vmem:[%s3273_s1 + $0x88] sm:$0xff]  ;;  %v161_v10 = vld [vmem:[%s3273_s1 + $0x178] sm:$0xff] }
  0x49   :  { %508 = vmatpush.msrb.mxu0 %v1646_v11  ;;  %550 = vmatpush.msrb.mxu1 %v1676_v12  ;;  %v193_v11 = vld [vmem:[%s3273_s1 + $0x278] sm:$0xff]  ;;  %v194_v12 = vld [vmem:[%s3273_s1 + $0x280] sm:$0xff] }
  0x4a   :  { %362 = vmatmul.f32.gmra.mxu0 %v2374_v13  ;;  %403 = vmatmul.f32.gmra.mxu1 %v2379_v17 }
  0x4b   :  { %444 = vmatmul.f32.gmra.mxu2 %v2384_v18  ;;  %509 = vmatpush.msrb.mxu0 %v1644_v19  ;;  %v129_v19 = vld [vmem:[%s3273_s1 + $0x78] sm:$0xff] }
  0x4c   :  { %485 = vmatmul.f32.gmra.mxu3 %v2374_v13  ;;  %592 = vmatpush.msrb.mxu2 %v114_v20  ;;  %v159_v20 = vld [vmem:[%s3273_s1 + $0x168] sm:$0xff] }
  0x4d   :  { %633 = vmatpush.msrb.mxu3 %v146_v21  ;;  %510 = vmatpush.msrb.mxu0 %v1642_v22  ;;  %v191_v21 = vld [vmem:[%s3273_s1 + $0x268] sm:$0xff]  ;;  %v192_v22 = vld [vmem:[%s3273_s1 + $0x270] sm:$0xff] }
  0x4e   :  { %551 = vmatpush.msrb.mxu1 %v1674_v23  ;;  %741 = vmatpush.msra.mxu2 %v177_v24  ;;  %v127_v23 = vld [vmem:[%s3273_s1 + $0x68] sm:$0xff]  ;;  %v157_v24 = vld [vmem:[%s3273_s1 + $0x158] sm:$0xff] }
  0x4f   :  { %782 = vmatpush.msra.mxu3 %v209_v25  ;;  %659 = vmatpush.msra.mxu0 %v208_v28  ;;  %v189_v25 = vld [vmem:[%s3273_s1 + $0x258] sm:$0xff]  ;;  %v155_v28 = vld [vmem:[%s3273_s1 + $0x148] sm:$0xff] }
  0x50   :  { %700 = vmatpush.msra.mxu1 %v145_v26  ;;  %742 = vmatpush.msra.mxu2 %v175_v27  ;;  %v190_v26 = vld [vmem:[%s3273_s1 + $0x260] sm:$0xff]  ;;  %v125_v27 = vld [vmem:[%s3273_s1 + $0x58] sm:$0xff] }
  0x51   :  { %783 = vmatpush.msra.mxu3 %v207_v32  ;;  %660 = vmatpush.msra.mxu0 %v206_v39  ;;  %v187_v32 = vld [vmem:[%s3273_s1 + $0x248] sm:$0xff]  ;;  %v185_v39 = vld [vmem:[%s3273_s1 + $0x238] sm:$0xff] }
  0x52   :  { %701 = vmatpush.msra.mxu1 %v143_v33  ;;  %365 = vmatmul.f32.gmra.mxu0 %v2429_v34  ;;  %v188_v33 = vld [vmem:[%s3273_s1 + $0x250] sm:$0xff] }
  0x53   :  { %406 = vmatmul.f32.gmra.mxu1 %v2434_v35  ;;  %447 = vmatmul.f32.gmra.mxu2 %v2439_v36 }
  0x54   :  { %784 = vmatpush.msra.mxu3 %v205_v37  ;;  %743 = vmatpush.msra.mxu2 %v173_v38  ;;  %v123_v37 = vld [vmem:[%s3273_s1 + $0x48] sm:$0xff]  ;;  %v153_v38 = vld [vmem:[%s3273_s1 + $0x138] sm:$0xff] }
  0x55   :  { %488 = vmatmul.f32.gmra.mxu3 %v2429_v34  ;;  %702 = vmatpush.msra.mxu1 %v141_v40  ;;  %v186_v40 = vld [vmem:[%s3273_s1 + $0x240] sm:$0xff] }
  0x56   :  { %744 = vmatpush.msra.mxu2 %v171_v41  ;;  %785 = vmatpush.msra.mxu3 %v203_v42  ;;  %v121_v41 = vld [vmem:[%s3273_s1 + $0x38] sm:$0xff]  ;;  %v151_v42 = vld [vmem:[%s3273_s1 + $0x128] sm:$0xff] }
  0x57   :  { %661 = vmatpush.msra.mxu0 %v204_v43  ;;  %703 = vmatpush.msra.mxu1 %v139_v47  ;;  %v183_v43 = vld [vmem:[%s3273_s1 + $0x228] sm:$0xff]  ;;  %v184_v47 = vld [vmem:[%s3273_s1 + $0x230] sm:$0xff] }
  0x58   :  { %745 = vmatpush.msra.mxu2 %v169_v48  ;;  %786 = vmatpush.msra.mxu3 %v201_v49  ;;  %v119_v48 = vld [vmem:[%s3273_s1 + $0x28] sm:$0xff]  ;;  %v149_v49 = vld [vmem:[%s3273_s1 + $0x118] sm:$0xff] }
  0x59   :  { %662 = vmatpush.msra.mxu0 %v202_v50  ;;  %704 = vmatpush.msra.mxu1 %v137_v51  ;;  %v181_v50 = vld [vmem:[%s3273_s1 + $0x218] sm:$0xff]  ;;  %v182_v51 = vld [vmem:[%s3273_s1 + $0x220] sm:$0xff] }
  0x5a   :  { %368 = vmatmul.f32.gmra.mxu0 %v1606_v52  ;;  %787 = vmatpush.msra.mxu3 %v199_v55  ;;  %v147_v55 = vld [vmem:[%s3273_s1 + $0x108] sm:$0xff] }
  0x5b   :  { %409 = vmatmul.f32.gmra.mxu1 %v2487_v53  ;;  %450 = vmatmul.f32.gmra.mxu2 %v2492_v54 }
  0x5c   :  { %746 = vmatpush.msra.mxu2 %v167_v56  ;;  %663 = vmatpush.msra.mxu0 %v200_v57  ;;  %v180_v56 = vld [vmem:[%s3273_s1 + $0x210] sm:$0xff]  ;;  %v179_v57 = vld [vmem:[%s3273_s1 + $0x208] sm:$0xff] }
  0x5d   :  { %491 = vmatmul.f32.gmra.mxu3 %v1606_v52  ;;  %705 = vmatpush.msra.mxu1 %v135_v58  ;;  %v117_v52 = vld [vmem:[%s3273_s1 + $0x18] sm:$0xff]  ;;  %v178_v58 = vld [vmem:[%s3273_s1 + $0x200] sm:$0xff] }
  0x5e   :  { %747 = vmatpush.msra.mxu2 %v165_v62  ;;  %788 = vmatpush.msra.mxu3 %v197_v2  ;;  %v115_v62 = vld [vmem:[%s3273_s1 + $0x8] sm:$0xff] }
  0x5f   :  { %664 = vmatpush.msra.mxu0 %v198_v3  ;;  %706 = vmatpush.msra.mxu1 %v133_v4 }
  0x60   :  { %748 = vmatpush.msra.mxu2 %v163_v5  ;;  %789 = vmatpush.msra.mxu3 %v195_v6 }
  0x61   :  { %665 = vmatpush.msra.mxu0 %v196_v8  ;;  %707 = vmatpush.msra.mxu1 %v131_v9 }
  0x62   :  { %511 = vmatmul.f32.vlgmr.msrb.gmra.mxu0 %v2104_v0  ;;  %749 = vmatpush.msra.mxu2 %v161_v10 }
  0x63   :  { %552 = vmatmul.f32.vlgmr.msrb.gmra.mxu1 %v2109_v1  ;;  %593 = vmatmul.f32.vlgmr.msrb.gmra.mxu2 %v3283_v7 }
  0x64   :  { %790 = vmatpush.msra.mxu3 %v193_v11  ;;  %666 = vmatpush.msra.mxu0 %v194_v12 }
  0x65   :  { %634 = vmatmul.f32.vlgmr.msrb.gmra.mxu3 %v3283_v7  ;;  %708 = vmatpush.msra.mxu1 %v129_v19 }
  0x66   :  { %750 = vmatpush.msra.mxu2 %v159_v20  ;;  %791 = vmatpush.msra.mxu3 %v191_v21 }
  0x67   :  { %667 = vmatpush.msra.mxu0 %v192_v22  ;;  %709 = vmatpush.msra.mxu1 %v127_v23  ;;  %v1752_v22 = vld [vmem:[%s3275_s3 + $0x1f8] sm:$0xff] }
  0x68   :  { %751 = vmatpush.msra.mxu2 %v157_v24  ;;  %792 = vmatpush.msra.mxu3 %v189_v25  ;;  %v1021_v25 = vld [vmem:[%s3275_s3 + $0xf0] sm:$0xff] }
  0x69   :  { %668 = vmatpush.msra.mxu0 %v190_v26  ;;  %710 = vmatpush.msra.mxu1 %v125_v27  ;;  %v1751_v27 = vld [vmem:[%s3275_s3 + $0x1f0] sm:$0xff] }
  0x6a   :  { %514 = vmatmul.f32.gmra.mxu0 %v2159_v15  ;;  %752 = vmatpush.msra.mxu2 %v155_v28  ;;  %v1004_v28 = vld [vmem:[%s3275_s3 + $0x68] sm:$0xff] }
  0x6b   :  { %555 = vmatmul.f32.gmra.mxu1 %v2164_v16  ;;  %596 = vmatmul.f32.gmra.mxu2 %v2099_v63 }
  0x6c   :  { %793 = vmatpush.msra.mxu3 %v187_v32  ;;  %669 = vmatpush.msra.mxu0 %v188_v33  ;;  %v1020_v32 = vld [vmem:[%s3275_s3 + $0xe8] sm:$0xff] }
  0x6d   :  { %637 = vmatmul.f32.gmra.mxu3 %v2104_v0  ;;  %711 = vmatpush.msra.mxu1 %v123_v37  ;;  %v1734_v33 = vld [vmem:[%s3275_s3 + $0x168] sm:$0xff] }
  0x6e   :  { %753 = vmatpush.msra.mxu2 %v153_v38  ;;  %794 = vmatpush.msra.mxu3 %v185_v39  ;;  %v1750_v37 = vld [vmem:[%s3275_s3 + $0x1e8] sm:$0xff]  ;;  %v1003_v38 = vld [vmem:[%s3275_s3 + $0x60] sm:$0xff] }
  0x6f   :  { %670 = vmatpush.msra.mxu0 %v186_v40  ;;  %712 = vmatpush.msra.mxu1 %v121_v41 }
  0x70   :  { %754 = vmatpush.msra.mxu2 %v151_v42  ;;  %795 = vmatpush.msra.mxu3 %v183_v43  ;;  %v1019_v42 = vld [vmem:[%s3275_s3 + $0xe0] sm:$0xff] }
  0x71   :  { %671 = vmatpush.msra.mxu0 %v184_v47  ;;  %713 = vmatpush.msra.mxu1 %v119_v48  ;;  %v1733_v47 = vld [vmem:[%s3275_s3 + $0x160] sm:$0xff] }
  0x72   :  { %517 = vmatmul.f32.gmra.mxu0 %v2214_v30  ;;  %755 = vmatpush.msra.mxu2 %v149_v49  ;;  %v1749_v48 = vld [vmem:[%s3275_s3 + $0x1e0] sm:$0xff]  ;;  %v1002_v49 = vld [vmem:[%s3275_s3 + $0x58] sm:$0xff] }
  0x73   :  { %558 = vmatmul.f32.gmra.mxu1 %v2219_v31  ;;  %599 = vmatmul.f32.gmra.mxu2 %v2154_v14 }
  0x74   :  { %796 = vmatpush.msra.mxu3 %v181_v50  ;;  %672 = vmatpush.msra.mxu0 %v182_v51  ;;  %v1018_v50 = vld [vmem:[%s3275_s3 + $0xd8] sm:$0xff] }
  0x75   :  { %640 = vmatmul.f32.gmra.mxu3 %v2159_v15  ;;  %714 = vmatpush.msra.mxu1 %v117_v52  ;;  %v1732_v51 = vld [vmem:[%s3275_s3 + $0x158] sm:$0xff] }
  0x76   :  { %756 = vmatpush.msra.mxu2 %v147_v55  ;;  %673 = vmatpush.msra.mxu0 %v180_v56  ;;  %v1748_v52 = vld [vmem:[%s3275_s3 + $0x1d8] sm:$0xff]  ;;  %v1001_v55 = vld [vmem:[%s3275_s3 + $0x50] sm:$0xff] }
  0x77   :  { %797 = vmatpush.msra.mxu3 %v179_v57  ;;  %715 = vmatpush.msra.mxu1 %v115_v62  ;;  %v1017_v62 = vld [vmem:[%s3275_s3 + $0xd0] sm:$0xff] }
  0x78   :  { %674 = vmatpush.msra.mxu0 %v178_v58 }
  0x79   :  { %1113 = vmatpush.msrb.mxu1 %v1752_v22  ;;  %v1000_v22 = vld [vmem:[%s3275_s3 + $0x48] sm:$0xff] }
  0x7a   :  { %520 = vmatmul.f32.gmra.mxu0 %v2269_v45 }
  0x7b   :  { %561 = vmatmul.f32.gmra.mxu1 %v2274_v46  ;;  %602 = vmatmul.f32.gmra.mxu2 %v2209_v29 }
  0x7c   :  { %1114 = vmatpush.msrb.mxu1 %v1751_v27  ;;  %v999_v27 = vld [vmem:[%s3275_s3 + $0x40] sm:$0xff] }
  0x7d   :  { %643 = vmatmul.f32.gmra.mxu3 %v2214_v30 }
  0x7e   :  { %1115 = vmatpush.msrb.mxu1 %v1750_v37  ;;  %v1015_v37 = vld [vmem:[%s3275_s3 + $0xc0] sm:$0xff] }
  0x80   :  { %1116 = vmatpush.msrb.mxu1 %v1749_v48  ;;  %v998_v48 = vld [vmem:[%s3275_s3 + $0x38] sm:$0xff] }
  0x82   :  { %523 = vmatmul.f32.gmra.mxu0 %v2324_v60  ;;  %1117 = vmatpush.msrb.mxu1 %v1748_v52  ;;  %v997_v52 = vld [vmem:[%s3275_s3 + $0x30] sm:$0xff] }
  0x83   :  { %564 = vmatmul.f32.gmra.mxu1 %v2329_v61  ;;  %605 = vmatmul.f32.gmra.mxu2 %v2264_v44 }
  0x85   :  { %646 = vmatmul.f32.gmra.mxu3 %v2269_v45 }
  0x8a   :  { %526 = vmatmul.f32.gmra.mxu0 %v2379_v17 }
  0x8b   :  { %567 = vmatmul.f32.gmra.mxu1 %v2384_v18  ;;  %608 = vmatmul.f32.gmra.mxu2 %v2319_v59 }
  0x8d   :  { %649 = vmatmul.f32.gmra.mxu3 %v2324_v60 }
  0x92   :  { %529 = vmatmul.f32.gmra.mxu0 %v2434_v35 }
  0x93   :  { %570 = vmatmul.f32.gmra.mxu1 %v2439_v36  ;;  %611 = vmatmul.f32.gmra.mxu2 %v2374_v13 }
  0x95   :  { %652 = vmatmul.f32.gmra.mxu3 %v2379_v17 }
  0x9a   :  { %532 = vmatmul.f32.gmra.mxu0 %v2487_v53 }
  0x9b   :  { %573 = vmatmul.f32.gmra.mxu1 %v2492_v54  ;;  %614 = vmatmul.f32.gmra.mxu2 %v2429_v34 }
  0x9d   :  { %655 = vmatmul.f32.gmra.mxu3 %v2434_v35 }
  0x9e   :  { %v2663_v2 = vpop.f32.mrf.mxu0 }
  0x9f   :  { %v2665_v3 = vpop.f32.mrf.mxu1 }
  0xa2   :  { %675 = vmatmul.f32.vlgmr.msra.gmra.mxu0 %v3283_v7 }
  0xa3   :  { %716 = vmatmul.f32.vlgmr.msra.gmra.mxu1 %v3283_v7  ;;  %757 = vmatmul.f32.vlgmr.msra.gmra.mxu2 %v3283_v7 }
  0xa5   :  { %798 = vmatmul.f32.vlgmr.msra.gmra.mxu3 %v3283_v7 }
  0xa6   :  { %v2671_v4 = vpop.f32.mrf.mxu2 }
  0xa7   :  { %v2673_v53 = vpop.f32.mrf.mxu0  ;;  %v2675_v54 = vpop.f32.mrf.mxu1 }
  0xa8   :  { %v2677_v5 = vpop.f32.mrf.mxu3 }
  0xaa   :  { %678 = vmatmul.f32.gmra.mxu0 %v2109_v1 }
  0xab   :  { %719 = vmatmul.f32.gmra.mxu1 %v2099_v63  ;;  %760 = vmatmul.f32.gmra.mxu2 %v2104_v0 }
  0xad   :  { %801 = vmatmul.f32.gmra.mxu3 %v2109_v1 }
  0xae   :  { %v2683_v6 = vpop.f32.mrf.mxu2 }
  0xaf   :  { %v2685_v8 = vpop.f32.mrf.mxu0  ;;  %v2687_v9 = vpop.f32.mrf.mxu1 }
  0xb0   :  { %v2689_v10 = vpop.f32.mrf.mxu3 }
  0xb2   :  { %681 = vmatmul.f32.gmra.mxu0 %v2164_v16 }
  0xb3   :  { %722 = vmatmul.f32.gmra.mxu1 %v2154_v14  ;;  %763 = vmatmul.f32.gmra.mxu2 %v2159_v15 }
  0xb5   :  { %804 = vmatmul.f32.gmra.mxu3 %v2164_v16 }
  0xb6   :  { %v2695_v63 = vpop.f32.mrf.mxu2 }
  0xb7   :  { %v2697_v0 = vpop.f32.mrf.mxu0  ;;  %v2699_v1 = vpop.f32.mrf.mxu1 }
  0xb8   :  { %v2701_v11 = vpop.f32.mrf.mxu3 }
  0xba   :  { %684 = vmatmul.f32.gmra.mxu0 %v2219_v31 }
  0xbb   :  { %725 = vmatmul.f32.gmra.mxu1 %v2209_v29  ;;  %766 = vmatmul.f32.gmra.mxu2 %v2214_v30 }
  0xbd   :  { %807 = vmatmul.f32.gmra.mxu3 %v2219_v31 }
  0xbe   :  { %v2707_v14 = vpop.f32.mrf.mxu2 }
  0xbf   :  { %v2709_v15 = vpop.f32.mrf.mxu0  ;;  %v2711_v16 = vpop.f32.mrf.mxu1 }
  0xc0   :  { %v2713_v12 = vpop.f32.mrf.mxu3 }
  0xc2   :  { %687 = vmatmul.f32.gmra.mxu0 %v2274_v46 }
  0xc3   :  { %728 = vmatmul.f32.gmra.mxu1 %v2264_v44  ;;  %769 = vmatmul.f32.gmra.mxu2 %v2269_v45 }
  0xc5   :  { %810 = vmatmul.f32.gmra.mxu3 %v2274_v46 }
  0xc6   :  { %v2719_v29 = vpop.f32.mrf.mxu2 }
  0xc7   :  { %v2721_v30 = vpop.f32.mrf.mxu0  ;;  %v2723_v31 = vpop.f32.mrf.mxu1 }
  0xc8   :  { %v2725_v19 = vpop.f32.mrf.mxu3 }
  0xca   :  { %690 = vmatmul.f32.gmra.mxu0 %v2329_v61 }
  0xcb   :  { %731 = vmatmul.f32.gmra.mxu1 %v2319_v59  ;;  %772 = vmatmul.f32.gmra.mxu2 %v2324_v60 }
  0xcd   :  { %813 = vmatmul.f32.gmra.mxu3 %v2329_v61 }
  0xce   :  { %v2731_v44 = vpop.f32.mrf.mxu2 }
  0xcf   :  { %v2733_v45 = vpop.f32.mrf.mxu0 }
  0xd0   :  { %v2735_v46 = vpop.f32.mrf.mxu1  ;;  %v2737_v20 = vpop.f32.mrf.mxu3 }
  0xd2   :  { %693 = vmatmul.f32.gmra.mxu0 %v2384_v18 }
  0xd3   :  { %734 = vmatmul.f32.gmra.mxu1 %v2374_v13  ;;  %775 = vmatmul.f32.gmra.mxu2 %v2379_v17  ;;  %v1006_v13 = vld [vmem:[%s3275_s3 + $0x78] sm:$0xff] }
  0xd4   :  { %v1022_v17 = vld [vmem:[%s3275_s3 + $0xf8] sm:$0xff]  ;;  %1154 = vmatpush.msrb.mxu2 %v1006_v13 }
  0xd5   :  { %816 = vmatmul.f32.gmra.mxu3 %v2384_v18  ;;  %v1736_v18 = vld [vmem:[%s3275_s3 + $0x178] sm:$0xff] }
  0xd6   :  { %v2743_v59 = vpop.f32.mrf.mxu2  ;;  %1195 = vmatpush.msrb.mxu3 %v1022_v17  ;;  %1072 = vmatpush.msrb.mxu0 %v1736_v18  ;;  %v1731_v17 = vld [vmem:[%s3275_s3 + $0x150] sm:$0xff] }
  0xd7   :  { %v2745_v60 = vpop.f32.mrf.mxu0  ;;  %v1747_v18 = vld [vmem:[%s3275_s3 + $0x1d0] sm:$0xff] }
  0xd8   :  { %v2747_v61 = vpop.f32.mrf.mxu1  ;;  %v2749_v21 = vpop.f32.mrf.mxu3  ;;  %1196 = vmatpush.msrb.mxu3 %v1021_v25  ;;  %1118 = vmatpush.msrb.mxu1 %v1747_v18  ;;  %v1730_v25 = vld [vmem:[%s3275_s3 + $0x148] sm:$0xff]  ;;  %v1013_v18 = vld [vmem:[%s3275_s3 + $0xb0] sm:$0xff] }
  0xd9   :  { %3284 = vst [vmem:[#allocation4_spill] sm:$0xff] %v2749_v21 }
  0xda   :  { %696 = vmatmul.f32.gmra.mxu0 %v2439_v36  ;;  %1197 = vmatpush.msrb.mxu3 %v1020_v32 }
  0xdb   :  { %737 = vmatmul.f32.gmra.mxu1 %v2429_v34  ;;  %778 = vmatmul.f32.gmra.mxu2 %v2434_v35  ;;  %v1005_v34 = vld [vmem:[%s3275_s3 + $0x70] sm:$0xff] }
  0xdc   :  { %1155 = vmatpush.msrb.mxu2 %v1005_v34  ;;  %1198 = vmatpush.msrb.mxu3 %v1019_v42  ;;  %v1016_v34 = vld [vmem:[%s3275_s3 + $0xc8] sm:$0xff]  ;;  %v1729_v42 = vld [vmem:[%s3275_s3 + $0x140] sm:$0xff] }
  0xdd   :  { %819 = vmatmul.f32.gmra.mxu3 %v2439_v36  ;;  %v1735_v36 = vld [vmem:[%s3275_s3 + $0x170] sm:$0xff] }
  0xde   :  { %v2770_v23 = vpop.f32.mrf.mxu2  ;;  %1073 = vmatpush.msrb.mxu0 %v1735_v36  ;;  %1156 = vmatpush.msrb.mxu2 %v1004_v28  ;;  %v1746_v36 = vld [vmem:[%s3275_s3 + $0x1c8] sm:$0xff] }
  0xdf   :  { %3285 = vst [vmem:[#allocation5_spill] sm:$0xff] %v2770_v23  ;;  %v2772_v24 = vpop.f32.mrf.mxu0  ;;  %1199 = vmatpush.msrb.mxu3 %v1018_v50  ;;  %1119 = vmatpush.msrb.mxu1 %v1746_v36  ;;  %v1728_v50 = vld [vmem:[%s3275_s3 + $0x138] sm:$0xff] }
  0xe0   :  { %v2774_v35 = vpop.f32.mrf.mxu1  ;;  %v2779_v26 = vpop.f32.mrf.mxu3  ;;  %1074 = vmatpush.msrb.mxu0 %v1734_v33  ;;  %1157 = vmatpush.msrb.mxu2 %v1003_v38  ;;  %v994_v36 = vld [vmem:[%s3275_s3 + $0x18] sm:$0xff] }
  0xe1   :  { %3286 = vst [vmem:[#allocation6_spill] sm:$0xff] %v2779_v26  ;;  %1200 = vmatpush.msrb.mxu3 %v1017_v62  ;;  %v390_v26 = vadd.f32 %v2665_v3, %v2663_v2  ;;  %v1739_v2 = vld [vmem:[%s3275_s3 + $0x190] sm:$0xff] }
  0xe2   :  { %1075 = vmatpush.msrb.mxu0 %v1733_v47  ;;  %1158 = vmatpush.msrb.mxu2 %v1002_v49  ;;  %v1745_v47 = vld [vmem:[%s3275_s3 + $0x1c0] sm:$0xff]  ;;  %v1014_v49 = vld [vmem:[%s3275_s3 + $0xb8] sm:$0xff] }
  0xe3   :  { %1201 = vmatpush.msrb.mxu3 %v1016_v34  ;;  %1120 = vmatpush.msrb.mxu1 %v1745_v47  ;;  %v996_v34 = vld [vmem:[%s3275_s3 + $0x28] sm:$0xff]  ;;  %v1727_v47 = vld [vmem:[%s3275_s3 + $0x130] sm:$0xff]  ;;  %v431_v3 = vadd.f32 %v2671_v4, %v390_v26  ;;  %v393_v4 = vadd.f32 %v2675_v54, %v2673_v53 }
  0xe4   :  { %1076 = vmatpush.msrb.mxu0 %v1732_v51  ;;  %1159 = vmatpush.msrb.mxu2 %v1001_v55  ;;  %v1744_v51 = vld [vmem:[%s3275_s3 + $0x1b8] sm:$0xff] }
  0xe5   :  { %1202 = vmatpush.msrb.mxu3 %v1015_v37  ;;  %1121 = vmatpush.msrb.mxu1 %v1744_v51  ;;  %v1726_v51 = vld [vmem:[%s3275_s3 + $0x128] sm:$0xff] }
  0xe6   :  { %v2802_v39 = vpop.f32.mrf.mxu2  ;;  %1077 = vmatpush.msrb.mxu0 %v1731_v17  ;;  %1160 = vmatpush.msrb.mxu2 %v1000_v22 }
  0xe7   :  { %v2804_v40 = vpop.f32.mrf.mxu0  ;;  %1203 = vmatpush.msrb.mxu3 %v1014_v49 }
  0xe8   :  { %v2806_v41 = vpop.f32.mrf.mxu1  ;;  %v2811_v43 = vpop.f32.mrf.mxu3  ;;  %1078 = vmatpush.msrb.mxu0 %v1730_v25  ;;  %1161 = vmatpush.msrb.mxu2 %v999_v27  ;;  %v995_v25 = vld [vmem:[%s3275_s3 + $0x20] sm:$0xff] }
  0xe9   :  { %1204 = vmatpush.msrb.mxu3 %v1013_v18  ;;  %v1011_v18 = vld [vmem:[%s3275_s3 + $0xa0] sm:$0xff] }
  0xea   :  { %1079 = vmatpush.msrb.mxu0 %v1729_v42  ;;  %1162 = vmatpush.msrb.mxu2 %v998_v48  ;;  %v993_v48 = vld [vmem:[%s3275_s3 + $0x10] sm:$0xff] }
  0xec   :  { %1080 = vmatpush.msrb.mxu0 %v1728_v50  ;;  %1163 = vmatpush.msrb.mxu2 %v997_v52  ;;  %v1012_v50 = vld [vmem:[%s3275_s3 + $0xa8] sm:$0xff] }
  0xed   :  { %v992_v52 = vld [vmem:[%s3275_s3 + $0x8] sm:$0xff]  ;;  %1205 = vmatpush.msrb.mxu3 %v1012_v50 }
  0xee   :  { %v2834_v56 = vpop.f32.mrf.mxu2  ;;  %1164 = vmatpush.msrb.mxu2 %v996_v34  ;;  %1081 = vmatpush.msrb.mxu0 %v1727_v47  ;;  %v1725_v34 = vld [vmem:[%s3275_s3 + $0x120] sm:$0xff]  ;;  %v1724_v47 = vld [vmem:[%s3275_s3 + $0x118] sm:$0xff] }
  0xef   :  { %v2836_v57 = vpop.f32.mrf.mxu0  ;;  %1206 = vmatpush.msrb.mxu3 %v1011_v18  ;;  %v1009_v18 = vld [vmem:[%s3275_s3 + $0x90] sm:$0xff] }
  0xf0   :  { %v2838_v58 = vpop.f32.mrf.mxu1  ;;  %v2843_v13 = vpop.f32.mrf.mxu3  ;;  %1165 = vmatpush.msrb.mxu2 %v995_v25  ;;  %1082 = vmatpush.msrb.mxu0 %v1726_v51  ;;  %v991_v25 = vld [vmem:[%s3275_s3] sm:$0xff] }
  0xf2   :  { %1166 = vmatpush.msrb.mxu2 %v994_v36  ;;  %1083 = vmatpush.msrb.mxu0 %v1725_v34  ;;  %v1010_v36 = vld [vmem:[%s3275_s3 + $0x98] sm:$0xff]  ;;  %v1723_v34 = vld [vmem:[%s3275_s3 + $0x110] sm:$0xff] }
  0xf3   :  { %1207 = vmatpush.msrb.mxu3 %v1010_v36  ;;  %v1742_v36 = vld [vmem:[%s3275_s3 + $0x1a8] sm:$0xff] }
  0xf4   :  { %1167 = vmatpush.msrb.mxu2 %v993_v48  ;;  %1084 = vmatpush.msrb.mxu0 %v1724_v47  ;;  %v1722_v47 = vld [vmem:[%s3275_s3 + $0x108] sm:$0xff] }
  0xf5   :  { %1208 = vmatpush.msrb.mxu3 %v1009_v18  ;;  %v1721_v18 = vld [vmem:[%s3275_s3 + $0x100] sm:$0xff] }
  0xf6   :  { %v2866_v28 = vpop.f32.mrf.mxu2  ;;  %1168 = vmatpush.msrb.mxu2 %v992_v52  ;;  %v1743_v52 = vld [vmem:[%s3275_s3 + $0x1b0] sm:$0xff]  ;;  %1085 = vmatpush.msrb.mxu0 %v1723_v34  ;;  %v1007_v34 = vld [vmem:[%s3275_s3 + $0x80] sm:$0xff] }
  0xf7   :  { %v2868_v32 = vpop.f32.mrf.mxu0  ;;  %1122 = vmatpush.msrb.mxu1 %v1743_v52  ;;  %v1741_v52 = vld [vmem:[%s3275_s3 + $0x1a0] sm:$0xff] }
  0xf8   :  { %v2870_v33 = vpop.f32.mrf.mxu1  ;;  %v2875_v38 = vpop.f32.mrf.mxu3  ;;  %1169 = vmatpush.msrb.mxu2 %v991_v25  ;;  %1086 = vmatpush.msrb.mxu0 %v1722_v47 }
  0xf9   :  { %1170 = vmatmul.f32.vlgmr.msrb.gmra.mxu2 %v3283_v7  ;;  %v1008_v7 = vld [vmem:[%s3275_s3 + $0x88] sm:$0xff]  ;;  %1123 = vmatpush.msrb.mxu1 %v1742_v36  ;;  %v3289_v36 = vmov 0.0  }
  0xfa   :  { %1209 = vmatpush.msrb.mxu3 %v1008_v7  ;;  %v1740_v7 = vld [vmem:[%s3275_s3 + $0x198] sm:$0xff]  ;;  %1087 = vmatpush.msrb.mxu0 %v1721_v18  ;;  %v1738_v18 = vld [vmem:[%s3275_s3 + $0x188] sm:$0xff] }
  0xfb   :  { %1124 = vmatpush.msrb.mxu1 %v1741_v52 }
  0xfc   :  { %1210 = vmatpush.msrb.mxu3 %v1007_v34  ;;  %v595_v34 = vadd.f32 %v2802_v39, %v431_v3  ;;  %v513_v39 = vadd.f32 %v2772_v24, %v2677_v5 }
  0xfd   :  { %1211 = vmatmul.f32.vlgmr.msrb.gmra.mxu3 %v3289_v36  ;;  %1125 = vmatpush.msrb.mxu1 %v1740_v7  ;;  %v823_v7 = vld [vmem:[%s3276_s2] sm:$0x3] }
  0xfe   :  { %v2898_v55 = vpop.f32.mrf.mxu2  ;;  %v1737_v36 = vld [vmem:[%s3275_s3 + $0x180] sm:$0xff]  ;;  %v636_v26 = vadd.f32 %v2811_v43, %v595_v34  ;;  %v554_v54 = vadd.f32 %v2774_v35, %v513_v39  ;;  %v396_v43 = vadd.f32 %v2687_v9, %v2685_v8 }
  0xff   :  { %v2900_v62 = vpop.f32.mrf.mxu0  ;;  %1126 = vmatpush.msrb.mxu1 %v1739_v2 }
 0x100   :  { %v2902_v17 = vpop.f32.mrf.mxu1  ;;  %v2907_v22 = vpop.f32.mrf.mxu3 }
 0x101   :  { %1127 = vmatpush.msrb.mxu1 %v1738_v18 }
 0x103   :  { %1128 = vmatpush.msrb.mxu1 %v1737_v36 }
 0x106   :  { %v2918_v27 = vpop.f32.mrf.mxu2 }
 0x107   :  { %v2920_v37 = vpop.f32.mrf.mxu0 }
 0x108   :  { %v2922_v42 = vpop.f32.mrf.mxu1  ;;  %v2930_v49 = vpop.f32.mrf.mxu3 }
 0x10e   :  { %v2956_v48 = vpop.f32.mrf.mxu2 }
 0x10f   :  { %v2958_v50 = vpop.f32.mrf.mxu0 }
 0x110   :  { %3287 = vst [vmem:[#allocation7_spill] sm:$0xff] %v2958_v50  ;;  %v2960_v51 = vpop.f32.mrf.mxu1  ;;  %v2972_v25 = vpop.f32.mrf.mxu3 }
 0x111   :  { %3288 = vst [vmem:[#allocation8_spill] sm:$0xff] %v2960_v51 }
 0x116   :  { %v2998_v47 = vpop.f32.mrf.mxu2 }
 0x117   :  { %v3000_v51 = vpop.f32.mrf.mxu0 }
 0x118   :  { %3290 = vst [vmem:[#allocation9_spill] sm:$0xff] %v3000_v51  ;;  %v3002_v23 = vpop.f32.mrf.mxu1  ;;  %v3008_v52 = vpop.f32.mrf.mxu3  ;;  %v434_v51 = vadd.f32 %v2683_v6, %v393_v4  ;;  %v516_v6 = vadd.f32 %v2804_v40, %v2689_v10  ;;  %v399_v10 = vadd.f32 %v2699_v1, %v2697_v0 }
 0x119   :  { %3291 = vst [vmem:[#allocation10_spill] sm:$0xff] %v3002_v23  ;;  %v3025_v23 = vperm.slane %v823_v7, 0 }
 0x11a   :  { %3292 = vst [vmem:[#allocation11_spill] sm:$0xff] %v3008_v52  ;;  %v598_v52 = vadd.f32 %v2834_v56, %v434_v51  ;;  %v3040_v56 = vperm.slane %v823_v7, 1 }
 0x11c   :  { %v639_v5 = vadd.f32 %v2843_v13, %v598_v52  ;;  %v557_v13 = vadd.f32 %v2806_v41, %v516_v6  ;;  %v440_v6 = vadd.f32 %v2707_v14, %v399_v10  ;;  %v402_v14 = vadd.f32 %v2711_v16, %v2709_v15 }
 0x11d   :  { %v522_v10 = vadd.f32 %v2868_v32, %v2713_v12 }
 0x11e   :  { %v3023_v2 = vpop.f32.mrf.mxu2 }
 0x11f   :  { %v676_v3 = vpop.f32.mrf.mxu0  ;;  %v563_v32 = vadd.f32 %v2870_v33, %v522_v10 }
 0x120   :  { %v717_v18 = vpop.f32.mrf.mxu1  ;;  %v3030_v50 = vpop.f32.mrf.mxu3  ;;  %v677_v21 = vadd.f32 %v676_v3, %v636_v26 }
 0x121   :  { %v718_v36 = vadd.f32 %v717_v18, %v554_v54 }
 0x122   :  { %v829_v53 = vadd.f32 %v3025_v23, %v677_v21  ;;  %v437_v21 = vadd.f32 %v2695_v63, %v396_v43 }
 0x124   :  { %v861_v34 = vmul.f32 1.442695, %v829_v53  ;;  %v601_v8 = vadd.f32 %v2866_v28, %v437_v21  ;;  %v519_v28 = vadd.f32 %v2836_v57, %v2701_v11  ;;  %vm845_vm0 = vcmp.gt.f32.partialorder %v829_v53, 0.0 }
 0x126   :  { %1804 = vpow2.f32 %v861_v34  ;;  %v758_v24 = vpop.f32.mrf.mxu2  ;;  %v642_v63 = vadd.f32 %v2875_v38, %v601_v8  ;;  %v560_v11 = vadd.f32 %v2838_v58, %v519_v28 }
 0x127   :  { %v759_v4 = vadd.f32 %v758_v24, %v718_v36  ;;  %v679_v26 = vpop.f32.mrf.mxu0 }
 0x128   :  { %v720_v3 = vpop.f32.mrf.mxu1  ;;  %v680_v35 = vadd.f32 %v679_v26, %v639_v5  ;;  %v799_v51 = vpop.f32.mrf.mxu3 }
 0x129   :  { %v800_v39 = vadd.f32 %v799_v51, %v759_v4  ;;  %v721_v54 = vadd.f32 %v720_v3, %v557_v13  ;;  %v604_v3 = vadd.f32 %v2898_v55, %v440_v6 }
 0x12a   :  { %v831_v9 = vadd.f32 %v3025_v23, %v680_v35 }
 0x12b   :  { %v830_v52 = vadd.f32 %v3040_v56, %v800_v39  ;;  %v645_v13 = vadd.f32 %v2907_v22, %v604_v3 }
 0x12c   :  { %v1805_v18 = vpop.eup %1804  ;;  %v865_v40 = vmul.f32 1.442695, %v831_v9  ;;  %vm847_vm1 = vcmp.gt.f32.partialorder %v831_v9, 0.0 }
 0x12d   :  { %v1705_v7 = vadd.f32 -1.0, %v1805_v18  ;;  %v863_v34 = vmul.f32 1.442695, %v830_v52  ;;  %vm846_vm2 = vcmp.gt.f32.partialorder %v830_v52, 0.0 }
 0x12e   :  { %1806 = vpow2.f32 %v865_v40  ;;  %v761_v43 = vpop.f32.mrf.mxu2 }
 0x12f   :  { %v909_v36 = vmul.f32 1.6732632, %v1705_v7  ;;  %1808 = vpow2.f32 %v863_v34  ;;  %v762_v41 = vadd.f32 %v761_v43, %v721_v54  ;;  %v682_v5 = vpop.f32.mrf.mxu0  ;;  %v443_v54 = vadd.f32 %v2719_v29, %v402_v14 }
 0x130   :  { %v723_v24 = vpop.f32.mrf.mxu1  ;;  %v683_v0 = vadd.f32 %v682_v5, %v642_v63  ;;  %v802_v1 = vpop.f32.mrf.mxu3 }
 0x131   :  { %v925_v4 = vsel %vm845_vm0, %v829_v53, %v909_v36  ;;  %v803_v26 = vadd.f32 %v802_v1, %v762_v41  ;;  %v724_v39 = vadd.f32 %v723_v24, %v560_v11  ;;  %v607_v36 = vadd.f32 %v2918_v27, %v443_v54 }
 0x132   :  { %v941_v38 = vmul.f32 1.050701, %v925_v4  ;;  %v3055_v21 = vadd.f32 %v3025_v23, %v683_v0  ;;  %v405_v0 = vadd.f32 %v2723_v31, %v2721_v30 }
 0x133   :  { %v3059_v57 = vadd.f32 %v3040_v56, %v803_v26  ;;  %v648_v33 = vadd.f32 %v2930_v49, %v607_v36 }
 0x134   :  { %v1807_v35 = vpop.eup %1806  ;;  %v869_v51 = vmul.f32 1.442695, %v3055_v21  ;;  %1088 = vmatmul.f32.vlgmr.msrb.gmra.mxu0 %v941_v38  ;;  %1173 = vmatmul.f32.gmra.mxu2 %v941_v38  ;;  %v525_v38 = vadd.f32 %v2900_v62, %v2725_v19  ;;  %v446_v14 = vadd.f32 %v2731_v44, %v405_v0  ;;  %vm849_vm3 = vcmp.gt.f32.partialorder %v3055_v21, 0.0 }
 0x135   :  { %v1809_v53 = vpop.eup %1808  ;;  %v867_v55 = vmul.f32 1.442695, %v3059_v57  ;;  %v1707_v8 = vadd.f32 -1.0, %v1807_v35  ;;  %vm848_vm4 = vcmp.gt.f32.partialorder %v3059_v57, 0.0 }
 0x136   :  { %v1706_v18 = vadd.f32 -1.0, %v1809_v53  ;;  %1810 = vpow2.f32 %v869_v51  ;;  %v764_v58 = vpop.f32.mrf.mxu2  ;;  %v566_v44 = vadd.f32 %v2902_v17, %v525_v38  ;;  %v3295_v38 = vld [vmem:[#allocation7_spill] sm:$0xff] }
 0x137   :  { %1812 = vpow2.f32 %v867_v55  ;;  %v765_v40 = vadd.f32 %v764_v58, %v724_v39  ;;  %v685_v15 = vpop.f32.mrf.mxu0  ;;  %v911_v7 = vmul.f32 1.6732632, %v1707_v8  ;;  %v610_v8 = vadd.f32 %v2956_v48, %v446_v14 }
 0x138   :  { %v726_v16 = vpop.f32.mrf.mxu1  ;;  %v910_v34 = vmul.f32 1.6732632, %v1706_v18  ;;  %v686_v63 = vadd.f32 %v685_v15, %v645_v13  ;;  %v805_v43 = vpop.f32.mrf.mxu3 }
 0x139   :  { %v806_v28 = vadd.f32 %v805_v43, %v765_v40  ;;  %v927_v22 = vsel %vm847_vm1, %v831_v9, %v911_v7  ;;  %v727_v9 = vadd.f32 %v726_v16, %v563_v32  ;;  %v651_v17 = vadd.f32 %v2972_v25, %v610_v8 }
 0x13a   :  { %v926_v41 = vsel %vm846_vm2, %v830_v52, %v910_v34  ;;  %v3071_v5 = vadd.f32 %v3025_v23, %v686_v63  ;;  %v943_v12 = vmul.f32 1.050701, %v927_v22  ;;  %v528_v34 = vadd.f32 %v2920_v37, %v2737_v20 }
 0x13b   :  { %v942_v24 = vmul.f32 1.050701, %v926_v41  ;;  %v3075_v6 = vadd.f32 %v3040_v56, %v806_v28  ;;  %vm1313_vm1 = vcmask 261120  }
 0x13c   :  { %v1811_v29 = vpop.eup %1810  ;;  %v873_v1 = vmul.f32 1.442695, %v3071_v5  ;;  %1091 = vmatmul.f32.gmra.mxu0 %v943_v12  ;;  %1176 = vmatmul.f32.gmra.mxu2 %v943_v12  ;;  %vm851_vm5 = vcmp.gt.f32.partialorder %v3071_v5, 0.0 }
 0x13d   :  { %v1813_v27 = vpop.eup %1812  ;;  %v871_v52 = vmul.f32 1.442695, %v3075_v6  ;;  %1129 = vmatmul.f32.vlgmr.msrb.gmra.mxu1 %v942_v24  ;;  %1214 = vmatmul.f32.gmra.mxu3 %v942_v24  ;;  %v1709_v4 = vadd.f32 -1.0, %v1811_v29  ;;  %vm850_vm6 = vcmp.gt.f32.partialorder %v3075_v6, 0.0 }
 0x13e   :  { %1814 = vpow2.f32 %v873_v1  ;;  %v767_v26 = vpop.f32.mrf.mxu2  ;;  %v1708_v3 = vadd.f32 -1.0, %v1813_v27 }
 0x13f   :  { %1816 = vpow2.f32 %v871_v52  ;;  %v768_v30 = vadd.f32 %v767_v26, %v727_v9  ;;  %v688_v31 = vpop.f32.mrf.mxu0  ;;  %v913_v35 = vmul.f32 1.6732632, %v1709_v4 }
 0x140   :  { %v729_v11 = vpop.f32.mrf.mxu1  ;;  %v689_v51 = vadd.f32 %v688_v31, %v648_v33  ;;  %v808_v53 = vpop.f32.mrf.mxu3  ;;  %v912_v39 = vmul.f32 1.6732632, %v1708_v3  ;;  %v3294_v3 = vld [vmem:[#allocation4_spill] sm:$0xff] }
 0x141   :  { %v809_v55 = vadd.f32 %v808_v53, %v768_v30  ;;  %v929_v49 = vsel %vm849_vm3, %v3055_v21, %v913_v35  ;;  %v408_v21 = vadd.f32 %v2735_v46, %v2733_v45  ;;  %v730_v15 = vadd.f32 %v729_v11, %v566_v44  ;;  %v3296_v11 = vld [vmem:[#allocation5_spill] sm:$0xff] }
 0x142   :  { %v3090_v19 = vadd.f32 %v3025_v23, %v689_v51  ;;  %v945_v62 = vmul.f32 1.050701, %v929_v49  ;;  %v928_v13 = vsel %vm848_vm4, %v3059_v57, %v912_v39  ;;  %v531_v30 = vadd.f32 %v3295_v38, %v3294_v3 }
 0x143   :  { %v3095_v18 = vadd.f32 %v3040_v56, %v809_v55  ;;  %v944_v58 = vmul.f32 1.050701, %v928_v13  ;;  %v449_v28 = vadd.f32 %v2743_v59, %v408_v21  ;;  %v569_v59 = vadd.f32 %v2922_v42, %v528_v34  ;;  %v3293_v42 = vld [vmem:[#allocation11_spill] sm:$0xff]  ;;  %v3299_v34 = vld [vmem:[#allocation9_spill] sm:$0xff] }
 0x144   :  { %v1815_v10 = vpop.eup %1814  ;;  %v877_v40 = vmul.f32 1.442695, %v3090_v19  ;;  %1094 = vmatmul.f32.gmra.mxu0 %v945_v62  ;;  %1179 = vmatmul.f32.gmra.mxu2 %v945_v62  ;;  %vm853_vm7 = vcmp.gt.f32.partialorder %v3090_v19, 0.0 }
 0x145   :  { %v1817_v48 = vpop.eup %1816  ;;  %v875_v16 = vmul.f32 1.442695, %v3095_v18  ;;  %1132 = vmatmul.f32.gmra.mxu1 %v944_v58  ;;  %1217 = vmatmul.f32.gmra.mxu3 %v944_v58  ;;  %v1711_v57 = vadd.f32 -1.0, %v1815_v10  ;;  %v613_v32 = vadd.f32 %v2998_v47, %v449_v28  ;;  %vm852_vm8 = vcmp.gt.f32.partialorder %v3095_v18, 0.0  ;;  %v3297_v58 = vld [vmem:[#allocation8_spill] sm:$0xff] }
 0x146   :  { %1818 = vpow2.f32 %v877_v40  ;;  %v770_v7 = vpop.f32.mrf.mxu2  ;;  %v1710_v54 = vadd.f32 -1.0, %v1817_v48  ;;  %v572_v10 = vadd.f32 %v3297_v58, %v531_v30 }
 0x147   :  { %1820 = vpow2.f32 %v875_v16  ;;  %v771_v45 = vadd.f32 %v770_v7, %v730_v15  ;;  %v691_v46 = vpop.f32.mrf.mxu0  ;;  %v915_v43 = vmul.f32 1.6732632, %v1711_v57  ;;  %v654_v4 = vadd.f32 %v3293_v42, %v613_v32 }
 0x148   :  { %v732_v63 = vpop.f32.mrf.mxu1  ;;  %v692_v22 = vadd.f32 %v691_v46, %v651_v17  ;;  %v811_v36 = vpop.f32.mrf.mxu3  ;;  %v914_v41 = vmul.f32 1.6732632, %v1710_v54  ;;  %v3298_v54 = vld [vmem:[#allocation6_spill] sm:$0xff] }
 0x149   :  { %v812_v12 = vadd.f32 %v811_v36, %v771_v45  ;;  %v931_v25 = vsel %vm851_vm5, %v3071_v5, %v915_v43  ;;  %v411_v5 = vadd.f32 %v2747_v61, %v2745_v60  ;;  %v733_v9 = vadd.f32 %v732_v63, %v569_v59 }
 0x14a   :  { %v3110_v20 = vadd.f32 %v3025_v23, %v692_v22  ;;  %v947_v37 = vmul.f32 1.050701, %v931_v25  ;;  %v930_v24 = vsel %vm850_vm6, %v3075_v6, %v914_v41  ;;  %v534_v45 = vadd.f32 %v3299_v34, %v3298_v54 }
 0x14b   :  { %v3115_v29 = vadd.f32 %v3040_v56, %v812_v12  ;;  %v946_v0 = vmul.f32 1.050701, %v930_v24  ;;  %v452_v35 = vadd.f32 %v3296_v11, %v411_v5  ;;  %v3300_v24 = vld [vmem:[#allocation10_spill] sm:$0xff] }
 0x14c   :  { %v1819_v1 = vpop.eup %1818  ;;  %v881_v27 = vmul.f32 1.442695, %v3110_v20  ;;  %1097 = vmatmul.f32.gmra.mxu0 %v947_v37  ;;  %1182 = vmatmul.f32.gmra.mxu2 %v947_v37  ;;  %vm855_vm9 = vcmp.gt.f32.partialorder %v3110_v20, 0.0  ;;  %v575_v59 = vadd.f32 %v3300_v24, %v534_v45  ;;  %v1775_v45 = vld [vmem:[%s3278_s5 + $0x78] sm:$0xff] }
 0x14d   :  { %v1821_v47 = vpop.eup %1820  ;;  %v879_v52 = vmul.f32 1.442695, %v3115_v29  ;;  %1135 = vmatmul.f32.gmra.mxu1 %v946_v0  ;;  %1220 = vmatmul.f32.gmra.mxu3 %v946_v0  ;;  %v1713_v6 = vadd.f32 -1.0, %v1819_v1  ;;  %v616_v8 = vadd.f32 %v3023_v2, %v452_v35  ;;  %vm854_vm10 = vcmp.gt.f32.partialorder %v3115_v29, 0.0 }
 0x14e   :  { %1822 = vpow2.f32 %v881_v27  ;;  %v773_v33 = vpop.f32.mrf.mxu2  ;;  %v1712_v26 = vadd.f32 -1.0, %v1821_v47  ;;  %1409 = vmatpush.msra.mxu3 %v1775_v45  ;;  %v1790_v45 = vld [vmem:[%s3278_s5 + $0xd8] sm:$0xff] }
 0x14f   :  { %1824 = vpow2.f32 %v879_v52  ;;  %v774_v60 = vadd.f32 %v773_v33, %v733_v9  ;;  %v694_v61 = vpop.f32.mrf.mxu0  ;;  %v917_v31 = vmul.f32 1.6732632, %v1713_v6  ;;  %v657_v17 = vadd.f32 %v3030_v50, %v616_v8 }
 0x150   :  { %v695_v14 = vadd.f32 %v694_v61, %v654_v4  ;;  %v735_v51 = vpop.f32.mrf.mxu1  ;;  %v814_v53 = vpop.f32.mrf.mxu3  ;;  %v916_v39 = vmul.f32 1.6732632, %v1712_v26 }
 0x151   :  { %v815_v55 = vadd.f32 %v814_v53, %v774_v60  ;;  %v933_v49 = vsel %vm853_vm7, %v3090_v19, %v917_v31  ;;  %v736_v19 = vadd.f32 %v735_v51, %v572_v10 }
 0x152   :  { %v841_v62 = vadd.f32 %v3025_v23, %v695_v14  ;;  %v949_v13 = vmul.f32 1.050701, %v933_v49  ;;  %v932_v44 = vsel %vm852_vm8, %v3095_v18, %v916_v39 }
 0x153   :  { %v840_v21 = vadd.f32 %v3040_v56, %v815_v55  ;;  %v948_v40 = vmul.f32 1.050701, %v932_v44 }
 0x154   :  { %v1823_v48 = vpop.eup %1822  ;;  %v885_v15 = vmul.f32 1.442695, %v841_v62  ;;  %1100 = vmatmul.f32.gmra.mxu0 %v949_v13  ;;  %1185 = vmatmul.f32.gmra.mxu2 %v949_v13  ;;  %vm857_vm11 = vcmp.gt.f32.partialorder %v841_v62, 0.0 }
 0x155   :  { %v1825_v16 = vpop.eup %1824  ;;  %v883_v57 = vmul.f32 1.442695, %v840_v21  ;;  %1138 = vmatmul.f32.gmra.mxu1 %v948_v40  ;;  %1223 = vmatmul.f32.gmra.mxu3 %v948_v40  ;;  %v1715_v2 = vadd.f32 -1.0, %v1823_v48  ;;  %vm856_vm12 = vcmp.gt.f32.partialorder %v840_v21, 0.0  ;;  %v1306_v40 = vld [vmem:[%s3278_s5 + $0x10] sm:$0xff] }
 0x156   :  { %1826 = vpow2.f32 %v885_v15  ;;  %v776_v7 = vpop.f32.mrf.mxu2  ;;  %v1714_v18 = vadd.f32 -1.0, %v1825_v16  ;;  %v1305_v15 = vld [vmem:[%s3278_s5 + $0x8] sm:$0xff] }
 0x157   :  { %1828 = vpow2.f32 %v883_v57  ;;  %v777_v46 = vadd.f32 %v776_v7, %v736_v19  ;;  %v697_v63 = vpop.f32.mrf.mxu0  ;;  %v919_v43 = vmul.f32 1.6732632, %v1715_v2  ;;  %v1770_v19 = vld [vmem:[%s3278_s5 + $0x58] sm:$0xff]  ;;  %v1304_v57 = vld [vmem:[%s3278_s5] sm:$0xff] }
 0x158   :  { %v698_v28 = vadd.f32 %v697_v63, %v657_v17  ;;  %v817_v22 = vpop.f32.mrf.mxu3  ;;  %v918_v36 = vmul.f32 1.6732632, %v1714_v18  ;;  %v738_v25 = vpop.f32.mrf.mxu1  ;;  %1380 = vmatpush.msra.mxu2 %v1770_v19  ;;  %v1764_v2 = vld [vmem:[%s3278_s5 + $0x38] sm:$0xff]  ;;  %v1763_v17 = vld [vmem:[%s3278_s5 + $0x30] sm:$0xff]  ;;  %v1762_v18 = vld [vmem:[%s3278_s5 + $0x28] sm:$0xff] }
 0x159   :  { %v818_v41 = vadd.f32 %v817_v22, %v777_v46  ;;  %v935_v12 = vsel %vm855_vm9, %v3110_v20, %v919_v43  ;;  %v739_v9 = vadd.f32 %v738_v25, %v575_v59  ;;  %1329 = vmatpush.msra.mxu0 %v1764_v2  ;;  %v1761_v46 = vld [vmem:[%s3278_s5 + $0x20] sm:$0xff] }
 0x15a   :  { %v843_v50 = vadd.f32 %v3025_v23, %v698_v28  ;;  %v951_v32 = vmul.f32 1.050701, %v935_v12  ;;  %v934_v37 = vsel %vm854_vm10, %v3115_v29, %v918_v36  ;;  %v3177_v22 = vld [vmem:[%s3277_s4] ss:$0 sm:$0xff]  ;;  %v1769_v36 = vld [vmem:[%s3278_s5 + $0x50] sm:$0xff]  ;;  %v1768_v12 = vld [vmem:[%s3278_s5 + $0x48] sm:$0xff] }
 0x15b   :  { %v842_v0 = vadd.f32 %v3040_v56, %v818_v41  ;;  %v950_v1 = vmul.f32 1.050701, %v934_v37  ;;  %1330 = vmatpush.msra.mxu0 %v1763_v17  ;;  %1381 = vmatpush.msra.mxu2 %v1769_v36  ;;  %v1767_v37 = vld [vmem:[%s3278_s5 + $0x40] sm:$0xff]  ;;  %vm1551_vm10 = vcmask 64512  }
 0x15c   :  { %v1827_v5 = vpop.eup %1826  ;;  %v889_v27 = vmul.f32 1.442695, %v843_v50  ;;  %1103 = vmatmul.f32.gmra.mxu0 %v951_v32  ;;  %1188 = vmatmul.f32.gmra.mxu2 %v951_v32  ;;  %vm859_vm13 = vcmp.gt.f32.partialorder %v843_v50, 0.0  ;;  %v1782_v17 = vld [vmem:[%s3278_s5 + $0xa0] sm:$0xff] }
 0x15d   :  { %v1829_v47 = vpop.eup %1828  ;;  %v887_v20 = vmul.f32 1.442695, %v842_v0  ;;  %1141 = vmatmul.f32.gmra.mxu1 %v950_v1  ;;  %1226 = vmatmul.f32.gmra.mxu3 %v950_v1  ;;  %v1717_v52 = vadd.f32 -1.0, %v1827_v5  ;;  %vm858_vm14 = vcmp.gt.f32.partialorder %v842_v0, 0.0 }
 0x15e   :  { %1830 = vpow2.f32 %v889_v27  ;;  %v779_v23 = vpop.f32.mrf.mxu2  ;;  %v1716_v6 = vadd.f32 -1.0, %v1829_v47  ;;  %1331 = vmatpush.msra.mxu0 %v1762_v18  ;;  %1382 = vmatpush.msra.mxu2 %v1768_v12  ;;  %v1774_v27 = vld [vmem:[%s3278_s5 + $0x70] sm:$0xff]  ;;  %v1788_v12 = vld [vmem:[%s3278_s5 + $0xc8] sm:$0xff] }
 0x15f   :  { %1832 = vpow2.f32 %v887_v20  ;;  %v780_v29 = vadd.f32 %v779_v23, %v739_v9  ;;  %v921_v42 = vmul.f32 1.6732632, %v1717_v52  ;;  %1410 = vmatpush.msra.mxu3 %v1774_v27  ;;  %v1773_v9 = vld [vmem:[%s3278_s5 + $0x68] sm:$0xff]  ;;  %v1772_v23 = vld [vmem:[%s3278_s5 + $0x60] sm:$0xff] }
 0x160   :  { %v820_v4 = vpop.f32.mrf.mxu3  ;;  %v920_v33 = vmul.f32 1.6732632, %v1716_v6  ;;  %1332 = vmatpush.msra.mxu0 %v1761_v46  ;;  %1383 = vmatpush.msra.mxu2 %v1767_v37 }
 0x161   :  { %v821_v26 = vadd.f32 %v820_v4, %v780_v29  ;;  %v937_v3 = vsel %vm857_vm11, %v841_v62, %v921_v42  ;;  %1411 = vmatpush.msra.mxu3 %v1773_v9 }
 0x162   :  { %v953_v38 = vmul.f32 1.050701, %v937_v3  ;;  %v936_v30 = vsel %vm856_vm12, %v840_v21, %v920_v33  ;;  %v1307_v21 = vld [vmem:[%s3278_s5 + $0x18] sm:$0xff]  ;;  %1496 = vmatpush.msrb.mxu2 %v1790_v45  ;;  %vm1582_vm12 = vcmask 15360  }
 0x163   :  { %v844_v60 = vadd.f32 %v3040_v56, %v821_v26  ;;  %v952_v61 = vmul.f32 1.050701, %v936_v30  ;;  %1352 = vmatpush.msra.mxu1 %v1307_v21  ;;  %1412 = vmatpush.msra.mxu3 %v1772_v23  ;;  %v1780_v26 = vld [vmem:[%s3278_s5 + $0x98] sm:$0xff] }
 0x164   :  { %v1831_v31 = vpop.eup %1830  ;;  %1106 = vmatmul.f32.gmra.mxu0 %v953_v38  ;;  %1191 = vmatmul.f32.gmra.mxu2 %v953_v38 }
 0x165   :  { %v1833_v11 = vpop.eup %1832  ;;  %v891_v35 = vmul.f32 1.442695, %v844_v60  ;;  %1144 = vmatmul.f32.gmra.mxu1 %v952_v61  ;;  %1229 = vmatmul.f32.gmra.mxu3 %v952_v61  ;;  %v1719_v14 = vadd.f32 -1.0, %v1831_v31  ;;  %vm860_vm15 = vcmp.gt.f32.partialorder %v844_v60, 0.0 }
 0x166   :  { %v1718_v51 = vadd.f32 -1.0, %v1833_v11  ;;  %1353 = vmatpush.msra.mxu1 %v1306_v40  ;;  %1438 = vmatpush.msrb.mxu0 %v1780_v26  ;;  %v1778_v11 = vld [vmem:[%s3278_s5 + $0x88] sm:$0xff] }
 0x167   :  { %1834 = vpow2.f32 %v891_v35  ;;  %v923_v53 = vmul.f32 1.6732632, %v1719_v14 }
 0x168   :  { %v922_v39 = vmul.f32 1.6732632, %v1718_v51  ;;  %1354 = vmatpush.msra.mxu1 %v1305_v15  ;;  %v1783_v15 = vld [vmem:[%s3278_s5 + $0xa8] sm:$0xff] }
 0x169   :  { %v939_v55 = vsel %vm859_vm13, %v843_v50, %v923_v53 }
 0x16a   :  { %v955_v49 = vmul.f32 1.050701, %v939_v55  ;;  %v938_v8 = vsel %vm858_vm14, %v842_v0, %v922_v39  ;;  %1355 = vmatpush.msra.mxu1 %v1304_v57  ;;  %v1777_v39 = vld [vmem:[%s3278_s5 + $0x80] sm:$0xff] }
 0x16b   :  { %v954_v62 = vmul.f32 1.050701, %v938_v8 }
 0x16c   :  { %1109 = vmatmul.f32.gmra.mxu0 %v955_v49 }
 0x16d   :  { %v1835_v56 = vpop.eup %1834  ;;  %1147 = vmatmul.f32.gmra.mxu1 %v954_v62  ;;  %1232 = vmatmul.f32.gmra.mxu3 %v954_v62 }
 0x16e   :  { %v1720_v13 = vadd.f32 -1.0, %v1835_v56  ;;  %v1785_v56 = vld [vmem:[%s3278_s5 + $0xb8] sm:$0xff] }
 0x16f   :  { %1467 = vmatpush.msrb.mxu1 %v1785_v56 }
 0x170   :  { %v924_v44 = vmul.f32 1.6732632, %v1720_v13 }
 0x172   :  { %v940_v58 = vsel %vm860_vm15, %v844_v60, %v924_v44  ;;  %v1779_v60 = vld [vmem:[%s3278_s5 + $0x90] sm:$0xff] }
 0x173   :  { %v956_v10 = vmul.f32 1.050701, %v940_v58  ;;  %1439 = vmatpush.msrb.mxu0 %v1779_v60 }
 0x175   :  { %1150 = vmatmul.f32.gmra.mxu1 %v956_v10  ;;  %1440 = vmatpush.msrb.mxu0 %v1778_v11  ;;  %v1784_v10 = vld [vmem:[%s3278_s5 + $0xb0] sm:$0xff] }
 0x176   :  { %1468 = vmatpush.msrb.mxu1 %v1784_v10 }
 0x177   :  { %1441 = vmatpush.msrb.mxu0 %v1777_v39 }
 0x178   :  { %1469 = vmatpush.msrb.mxu1 %v1783_v15 }
 0x17a   :  { %1470 = vmatpush.msrb.mxu1 %v1782_v17 }
 0x17c   :  { %v1171_v48 = vpop.f32.mrf.mxu2 }
 0x180   :  { %v1212_v7 = vpop.f32.mrf.mxu3 }
 0x1b1   :  { %v1089_v16 = vpop.f32.mrf.mxu0 }
 0x1b7   :  { %v1174_v54 = vpop.f32.mrf.mxu2 }
 0x1b9   :  { %v1092_v34 = vpop.f32.mrf.mxu0 }
 0x1ba   :  { %v1130_v63 = vpop.f32.mrf.mxu1 }
 0x1bb   :  { %v1131_v43 = vadd.f32 %v1130_v63, %v1089_v16 }
 0x1bd   :  { %v1172_v28 = vadd.f32 %v1171_v48, %v1131_v43  ;;  %v1789_v43 = vld [vmem:[%s3278_s5 + $0xd0] sm:$0xff] }
 0x1be   :  { %1497 = vmatpush.msrb.mxu2 %v1789_v43 }
 0x1bf   :  { %v1213_v41 = vadd.f32 %v1212_v7, %v1172_v28  ;;  %v1177_v24 = vpop.f32.mrf.mxu2 }
 0x1c0   :  { %v1215_v50 = vpop.f32.mrf.mxu3  ;;  %1498 = vmatpush.msrb.mxu2 %v1788_v12 }
 0x1c1   :  { %v1240_v25 = vadd.f32 %v3177_v22, %v1213_v41  ;;  %v1095_v32 = vpop.f32.mrf.mxu0 }
 0x1c2   :  { %v1133_v59 = vpop.f32.mrf.mxu1 }
 0x1c3   :  { %v1256_v0 = vmul.f32 1.442695, %v1240_v25  ;;  %v1134_v1 = vadd.f32 %v1133_v59, %v1092_v34  ;;  %vm1248_vm0 = vcmp.gt.f32.partialorder %v1240_v25, 0.0 }
 0x1c5   :  { %1836 = vpow2.f32 %v1256_v0  ;;  %v1175_v5 = vadd.f32 %v1174_v54, %v1134_v1 }
 0x1c7   :  { %v1216_v47 = vadd.f32 %v1215_v50, %v1175_v5  ;;  %v1180_v38 = vpop.f32.mrf.mxu2 }
 0x1c8   :  { %v1218_v20 = vpop.f32.mrf.mxu3 }
 0x1c9   :  { %v1241_v52 = vadd.f32 %v3177_v22, %v1216_v47  ;;  %v1098_v6 = vpop.f32.mrf.mxu0  ;;  %v1795_v47 = vld [vmem:[%s3278_s5 + $0xf8] sm:$0xff] }
 0x1ca   :  { %v1136_v29 = vpop.f32.mrf.mxu1  ;;  %1525 = vmatpush.msrb.mxu3 %v1795_v47  ;;  %v1802_v47 = vld [vmem:[%s3279_s6] ss:$0 sm:$0xff] }
 0x1cb   :  { %v1837_v42 = vpop.eup %1836  ;;  %v1258_v4 = vmul.f32 1.442695, %v1241_v52  ;;  %v1137_v33 = vadd.f32 %v1136_v29, %v1095_v32  ;;  %vm1249_vm2 = vcmp.gt.f32.partialorder %v1241_v52, 0.0  ;;  %v1793_v29 = vld [vmem:[%s3278_s5 + $0xe8] sm:$0xff] }
 0x1cc   :  { %v1753_v3 = vadd.f32 -1.0, %v1837_v42 }
 0x1cd   :  { %1838 = vpow2.f32 %v1258_v4  ;;  %v1178_v30 = vadd.f32 %v1177_v24, %v1137_v33  ;;  %v1787_v24 = vld [vmem:[%s3278_s5 + $0xc0] sm:$0xff] }
 0x1ce   :  { %v1280_v61 = vmul.f32 1.6732632, %v1753_v3  ;;  %1499 = vmatpush.msrb.mxu2 %v1787_v24  ;;  %v1792_v3 = vld [vmem:[%s3278_s5 + $0xe0] sm:$0xff] }
 0x1cf   :  { %v1219_v31 = vadd.f32 %v1218_v20, %v1178_v30  ;;  %v1183_v40 = vpop.f32.mrf.mxu2 }
 0x1d0   :  { %v1288_v35 = vsel %vm1248_vm0, %v1240_v25, %v1280_v61  ;;  %v1221_v14 = vpop.f32.mrf.mxu3 }
 0x1d1   :  { %v1296_v51 = vmul.f32 1.050701, %v1288_v35  ;;  %v1242_v53 = vadd.f32 %v3177_v22, %v1219_v31  ;;  %v1101_v44 = vpop.f32.mrf.mxu0 }
 0x1d2   :  { %v1139_v55 = vpop.f32.mrf.mxu1 }
 0x1d3   :  { %v1839_v49 = vpop.eup %1838  ;;  %v1260_v8 = vmul.f32 1.442695, %v1242_v53  ;;  %v1140_v62 = vadd.f32 %v1139_v55, %v1098_v6  ;;  %1766 = vmatmul.msk.f32.vlgmr.msra.gmra.mxu1 %vm1313_vm1, %v1296_v51  ;;  %vm1250_vm3 = vcmp.gt.f32.partialorder %v1242_v53, 0.0 }
 0x1d4   :  { %v1754_v13 = vadd.f32 -1.0, %v1839_v49 }
 0x1d5   :  { %1840 = vpow2.f32 %v1260_v8  ;;  %v1181_v58 = vadd.f32 %v1180_v38, %v1140_v62 }
 0x1d6   :  { %v1281_v21 = vmul.f32 1.6732632, %v1754_v13 }
 0x1d7   :  { %v1222_v48 = vadd.f32 %v1221_v14, %v1181_v58  ;;  %v1186_v25 = vpop.f32.mrf.mxu2 }
 0x1d8   :  { %v1289_v16 = vsel %vm1249_vm2, %v1241_v52, %v1281_v21  ;;  %v1224_v19 = vpop.f32.mrf.mxu3  ;;  %v1794_v52 = vld [vmem:[%s3278_s5 + $0xf0] sm:$0xff] }
 0x1d9   :  { %v1297_v57 = vmul.f32 1.050701, %v1289_v16  ;;  %v1243_v2 = vadd.f32 %v3177_v22, %v1222_v48  ;;  %v1104_v36 = vpop.f32.mrf.mxu0  ;;  %1526 = vmatpush.msrb.mxu3 %v1794_v52 }
 0x1da   :  { %v1142_v7 = vpop.f32.mrf.mxu1 }
 0x1db   :  { %v1841_v18 = vpop.eup %1840  ;;  %v1262_v54 = vmul.f32 1.442695, %v1243_v2  ;;  %v1143_v34 = vadd.f32 %v1142_v7, %v1101_v44  ;;  %1765 = vmatmul.msk.f32.vlgmr.msra.gmra.mxu0 %vm1313_vm1, %v1297_v57  ;;  %vm1251_vm4 = vcmp.gt.f32.partialorder %v1243_v2, 0.0  ;;  %1527 = vmatpush.msrb.mxu3 %v1793_v29 }
 0x1dc   :  { %v1755_v46 = vadd.f32 -1.0, %v1841_v18 }
 0x1dd   :  { %1842 = vpow2.f32 %v1262_v54  ;;  %v1184_v63 = vadd.f32 %v1183_v40, %v1143_v34  ;;  %1528 = vmatpush.msrb.mxu3 %v1792_v3 }
 0x1de   :  { %v1282_v28 = vmul.f32 1.6732632, %v1755_v46 }
 0x1df   :  { %v1225_v41 = vadd.f32 %v1224_v19, %v1184_v63  ;;  %v1189_v38 = vpop.f32.mrf.mxu2 }
 0x1e0   :  { %v1290_v50 = vsel %vm1250_vm3, %v1242_v53, %v1282_v28  ;;  %v1227_v59 = vpop.f32.mrf.mxu3 }
 0x1e1   :  { %v1298_v32 = vmul.f32 1.050701, %v1290_v50  ;;  %v1244_v37 = vadd.f32 %v3177_v22, %v1225_v41  ;;  %v1107_v4 = vpop.f32.mrf.mxu0  ;;  %v1546_v50 = vld [vmem:[%s3281_s7] sm:$0xff] }
 0x1e2   :  { %v1145_v0 = vpop.f32.mrf.mxu1  ;;  %1570 = vmatpush.msra.mxu0 %v1546_v50 }
 0x1e3   :  { %v1843_v1 = vpop.eup %1842  ;;  %v1264_v5 = vmul.f32 1.442695, %v1244_v37  ;;  %v1146_v27 = vadd.f32 %v1145_v0, %v1104_v36  ;;  %1771 = vmatmul.msk.f32.vlgmr.msra.gmra.mxu2 %vm1313_vm1, %v1298_v32  ;;  %vm1252_vm5 = vcmp.gt.f32.partialorder %v1244_v37, 0.0 }
 0x1e4   :  { %v1756_v9 = vadd.f32 -1.0, %v1843_v1 }
 0x1e5   :  { %1844 = vpow2.f32 %v1264_v5  ;;  %v1187_v20 = vadd.f32 %v1186_v25, %v1146_v27 }
 0x1e6   :  { %v1283_v23 = vmul.f32 1.6732632, %v1756_v9 }
 0x1e7   :  { %v1228_v6 = vadd.f32 %v1227_v59, %v1187_v20  ;;  %v1192_v10 = vpop.f32.mrf.mxu2 }
 0x1e8   :  { %v1291_v42 = vsel %vm1251_vm4, %v1243_v2, %v1283_v23  ;;  %v1230_v35 = vpop.f32.mrf.mxu3 }
 0x1e9   :  { %v1299_v33 = vmul.f32 1.050701, %v1291_v42  ;;  %v1245_v26 = vadd.f32 %v3177_v22, %v1228_v6  ;;  %v1110_v8 = vpop.f32.mrf.mxu0 }
 0x1ea   :  { %v1148_v30 = vpop.f32.mrf.mxu1 }
 0x1eb   :  { %v1845_v60 = vpop.eup %1844  ;;  %v1266_v61 = vmul.f32 1.442695, %v1245_v26  ;;  %v1149_v31 = vadd.f32 %v1148_v30, %v1107_v4  ;;  %1776 = vmatmul.msk.f32.vlgmr.msra.gmra.mxu3 %vm1313_vm1, %v1299_v33  ;;  %vm1253_vm6 = vcmp.gt.f32.partialorder %v1245_v26, 0.0 }
 0x1ec   :  { %v1757_v11 = vadd.f32 -1.0, %v1845_v60 }
 0x1ed   :  { %1846 = vpow2.f32 %v1266_v61  ;;  %v1190_v14 = vadd.f32 %v1189_v38, %v1149_v31 }
 0x1ee   :  { %v1284_v51 = vmul.f32 1.6732632, %v1757_v11 }
 0x1ef   :  { %v1231_v53 = vadd.f32 %v1230_v35, %v1190_v14 }
 0x1f0   :  { %v1292_v39 = vsel %vm1252_vm5, %v1244_v37, %v1284_v51  ;;  %v1233_v48 = vpop.f32.mrf.mxu3 }
 0x1f1   :  { %v1300_v55 = vmul.f32 1.050701, %v1292_v39  ;;  %v1246_v49 = vadd.f32 %v3177_v22, %v1231_v53 }
 0x1f2   :  { %v1151_v62 = vpop.f32.mrf.mxu1 }
 0x1f3   :  { %v1847_v56 = vpop.eup %1846  ;;  %v1268_v13 = vmul.f32 1.442695, %v1246_v49  ;;  %v1152_v44 = vadd.f32 %v1151_v62, %v1110_v8  ;;  %1781 = vmatmul.msk.f32.vlgmr.msrb.gmra.mxu0 %vm1313_vm1, %v1300_v55  ;;  %vm1254_vm7 = vcmp.gt.f32.partialorder %v1246_v49, 0.0 }
 0x1f4   :  { %v1758_v58 = vadd.f32 -1.0, %v1847_v56 }
 0x1f5   :  { %1848 = vpow2.f32 %v1268_v13  ;;  %v1193_v21 = vadd.f32 %v1192_v10, %v1152_v44 }
 0x1f6   :  { %v1285_v40 = vmul.f32 1.6732632, %v1758_v58 }
 0x1f7   :  { %v1234_v15 = vadd.f32 %v1233_v48, %v1193_v21 }
 0x1f8   :  { %v1293_v16 = vsel %vm1253_vm6, %v1245_v26, %v1285_v40  ;;  %v1803_v26 = vld [vmem:[%s3280_s8] ss:$0 sm:$0xff] }
 0x1f9   :  { %v1301_v19 = vmul.f32 1.050701, %v1293_v16  ;;  %v1247_v57 = vadd.f32 %v3177_v22, %v1234_v15 }
 0x1fb   :  { %v1849_v2 = vpop.eup %1848  ;;  %v1270_v17 = vmul.f32 1.442695, %v1247_v57  ;;  %1786 = vmatmul.msk.f32.vlgmr.msrb.gmra.mxu1 %vm1313_vm1, %v1301_v19  ;;  %vm1255_vm8 = vcmp.gt.f32.partialorder %v1247_v57, 0.0 }
 0x1fc   :  { %v1759_v7 = vadd.f32 -1.0, %v1849_v2 }
 0x1fd   :  { %1850 = vpow2.f32 %v1270_v17 }
 0x1fe   :  { %v1286_v18 = vmul.f32 1.6732632, %v1759_v7 }
 0x200   :  { %v1294_v54 = vsel %vm1254_vm7, %v1246_v49, %v1286_v18 }
 0x201   :  { %v1302_v34 = vmul.f32 1.050701, %v1294_v54 }
 0x203   :  { %v1851_v45 = vpop.eup %1850  ;;  %1791 = vmatmul.msk.f32.vlgmr.msrb.gmra.mxu2 %vm1313_vm1, %v1302_v34 }
 0x204   :  { %v1760_v46 = vadd.f32 -1.0, %v1851_v45 }
 0x206   :  { %v1287_v63 = vmul.f32 1.6732632, %v1760_v46 }
 0x208   :  { %v1295_v43 = vsel %vm1255_vm8, %v1247_v57, %v1287_v63 }
 0x209   :  { %v1303_v28 = vmul.f32 1.050701, %v1295_v43 }
 0x20b   :  { %1796 = vmatmul.msk.f32.vlgmr.msrb.gmra.mxu3 %vm1313_vm1, %v1303_v28 }
 0x250   :  { %v1357_v36 = vpop.f32.mrf.mxu1 }
 0x258   :  { %v1334_v22 = vpop.f32.mrf.mxu0 }
 0x259   :  { %v1358_v12 = vadd.f32 %v1357_v36, %v1334_v22 }
 0x266   :  { %v1385_v41 = vpop.f32.mrf.mxu2 }
 0x267   :  { %v1388_v32 = vadd.f32 %v1385_v41, %v1358_v12 }
 0x26e   :  { %v1414_v25 = vpop.f32.mrf.mxu3 }
 0x26f   :  { %v1417_v37 = vadd.f32 %v1414_v25, %v1388_v32 }
 0x270   :  { %v1443_v24 = vpop.f32.mrf.mxu0 }
 0x271   :  { %v1446_v0 = vadd.f32 %v1443_v24, %v1417_v37 }
 0x278   :  { %v1472_v59 = vpop.f32.mrf.mxu1 }
 0x279   :  { %v1475_v5 = vadd.f32 %v1472_v59, %v1446_v0 }
 0x286   :  { %v1501_v1 = vpop.f32.mrf.mxu2 }
 0x287   :  { %v1504_v27 = vadd.f32 %v1501_v1, %v1475_v5 }
 0x28e   :  { %v1530_v9 = vpop.f32.mrf.mxu3 }
 0x28f   :  { %v1533_v20 = vadd.f32 %v1530_v9, %v1504_v27 }
 0x291   :  { %v1538_v52 = vadd.f32 %v1802_v47, %v1533_v20 }
 0x293   :  { %v1540_v23 = vmul.f32 1.442695, %v1538_v52  ;;  %vm1539_vm9 = vcmp.gt.f32.partialorder %v1538_v52, 0.0 }
 0x295   :  { %1852 = vpow2.f32 %v1540_v23 }
 0x29b   :  { %v1853_v6 = vpop.eup %1852 }
 0x29c   :  { %v1797_v29 = vadd.f32 -1.0, %v1853_v6 }
 0x29e   :  { %v1543_v42 = vmul.f32 1.6732632, %v1797_v29 }
 0x2a0   :  { %v1544_v4 = vsel %vm1539_vm9, %v1538_v52, %v1543_v42 }
 0x2a1   :  { %v1545_v33 = vmul.f32 1.050701, %v1544_v4 }
 0x2a3   :  { %1798 = vmatmul.msk.f32.vlgmr.msra.gmra.mxu0 %vm1551_vm10, %v1545_v33 }
 0x320   :  { %v1572_v3 = vpop.f32.mrf.mxu0 }
 0x321   :  { %v1573_v38 = vadd.f32 %v1803_v26, %v1572_v3 }
 0x323   :  { %v1576_v30 = vmul.f32 1.442695, %v1573_v38  ;;  %vm1575_vm11 = vcmp.gt.f32.partialorder %v1573_v38, 0.0 }
 0x325   :  { %1854 = vpow2.f32 %v1576_v30 }
 0x32b   :  { %v1855_v60 = vpop.eup %1854 }
 0x32c   :  { %v1799_v61 = vadd.f32 -1.0, %v1855_v60 }
 0x32e   :  { %v1579_v31 = vmul.f32 1.6732632, %v1799_v61 }
 0x330   :  { %v1580_v11 = vsel %vm1575_vm11, %v1573_v38, %v1579_v31 }
 0x331   :  { %v1581_v35 = vmul.f32 1.050701, %v1580_v11 }
 0x333   :  { %1583 = vst.msk [vmem:[%s3282_s9] sm:$0xff] %vm1582_vm12, %v1581_v35 }

</bundles_post_ra>
